<compile_context>
chip_gen: v5e
topology: v5e:2x2
jax: 0.10.0
libtpu: 0.0.40
codegen_flags: <defaults>
</compile_context>

<pallas_src>
import functools
import math

import jax
import jax.numpy as jnp
from jax.experimental import pallas as pl
from jax.experimental.pallas import tpu as pltpu


# ----------------------------- fused Pallas kernel (all layers) -----------------------------

def _fused_encoder_kernel(src_ref, pos_ref,
                          wq_ref, wk_ref, wv_ref,
                          bq_ref, bk_ref, bv_ref,
                          wf_ref, bf_ref, lnw_ref, lnb_ref,
                          out_ref, aw_ref,
                          x_sc, aw_sc, *, nhead, nlayers):
    bt, seq, d_model = x_sc.shape
    hd = d_model // nhead
    rows = bt * seq
    layer = pl.program_id(1)

    # Layer 0: load the residual stream into the VMEM-resident activation scratch and
    # zero the attention-weight accumulator (P3 accumulator init).
    @pl.when(layer == 0)
    def _():
        x_sc[...] = src_ref[...].astype(jnp.float32)
        aw_sc[...] = jnp.zeros_like(aw_sc)

    x = x_sc[...]                                       # (bt, L, D) f32 resident activation
    pos = pos_ref[...].astype(jnp.float32)
    x2d = x.reshape(rows, d_model)
    qk_in = (x + pos).reshape(rows, d_model)            # q = k = src + pos

    # bf16 operands for the MXU; accumulation stays f32.  Elementwise math stays f32.
    x_bf = x2d.astype(jnp.bfloat16)
    qk_bf = qk_in.astype(jnp.bfloat16)

    wq = wq_ref[0]                                      # (nhead, D, hd)  bf16
    wk = wk_ref[0]
    wv = wv_ref[0]
    bq = bq_ref[0]                                      # (nhead, 1, hd)  f32
    bk = bk_ref[0]
    bv = bv_ref[0]
    wf = wf_ref[0]                                      # (nhead, hd, D)  bf16

    src2 = jnp.zeros((rows, d_model), jnp.float32)
    aw_layer = jnp.zeros((bt, seq, seq), jnp.float32)

    # Per-head attention: heads selected by a leading-axis index (no lane slicing),
    # batch dim handled by leading-batch einsums, src2 accumulated per head (no concat).
    for h in range(nhead):
        q = (jnp.dot(qk_bf, wq[h], preferred_element_type=jnp.float32)
             + bq[h]).reshape(bt, seq, hd)
        k = (jnp.dot(qk_bf, wk[h], preferred_element_type=jnp.float32)
             + bk[h]).reshape(bt, seq, hd)
        v = (jnp.dot(x_bf, wv[h], preferred_element_type=jnp.float32)
             + bv[h]).reshape(bt, seq, hd)

        s = jnp.einsum('bld,bmd->blm', q.astype(jnp.bfloat16), k.astype(jnp.bfloat16),
                       preferred_element_type=jnp.float32)
        s = s - jnp.max(s, axis=-1, keepdims=True)
        e = jnp.exp(s)
        # Exact reciprocal: these probabilities are also the user-visible attention
        # weights, so rows must sum to 1 (reciprocal over (bt, L, 1) is trivially cheap).
        p = e * pl.reciprocal(jnp.sum(e, axis=-1, keepdims=True))
        aw_layer = aw_layer + p

        ho = jnp.einsum('blm,bmd->bld', p.astype(jnp.bfloat16), v.astype(jnp.bfloat16),
                        preferred_element_type=jnp.float32)
        src2 = src2 + jnp.dot(ho.reshape(rows, hd).astype(jnp.bfloat16), wf[h],
                              preferred_element_type=jnp.float32)

    src2 = src2 + bf_ref[0]                              # fused out_proj + Linear bias

    # Residual + LayerNorm in f32 (dropout is identity at inference).
    xr = x2d + src2
    mean = jnp.mean(xr, axis=-1, keepdims=True)
    var = jnp.mean((xr - mean) ** 2, axis=-1, keepdims=True)
    y = (xr - mean) * jax.lax.rsqrt(var + 1e-5) * lnw_ref[0] + lnb_ref[0]
    y3 = y.reshape(bt, seq, d_model)

    aw_total = aw_sc[...] + aw_layer
    x_sc[...] = y3                                       # carry activation to next layer
    aw_sc[...] = aw_total

    # Final layer: write both outputs exactly once per batch block.
    @pl.when(layer == nlayers - 1)
    def _():
        out_ref[...] = y3.astype(out_ref.dtype)
        aw_ref[...] = (aw_total * (1.0 / (nhead * nlayers))).astype(aw_ref.dtype)


# ----------------------------- host-side parameter preparation -----------------------------

def prepare_stacked_params(raw_layer_params, *, nhead):
    """Pre-transpose / head-split / algebraically fuse PyTorch-layout weights and stack
    them over layers (one-time prep).  Matmul weights are stored in bf16."""
    d_model = raw_layer_params[0]["out_proj_w"].shape[0]
    hd = d_model // nhead
    scale = 1.0 / math.sqrt(hd)

    def head_major(w2d):
        # y = x @ w2d.T ; split the *output* features head-major -> (nhead, D, hd).
        return w2d.T.reshape(d_model, nhead, hd).transpose(1, 0, 2)

    def per_layer(rp):
        in_w = jnp.asarray(rp["in_proj_w"], jnp.float32)           # (3D, D)
        in_b = jnp.asarray(rp["in_proj_b"], jnp.float32).reshape(-1)

        wq = head_major(in_w[:d_model]) * scale                     # fold 1/sqrt(hd) into Wq
        wk = head_major(in_w[d_model:2 * d_model])
        wv = head_major(in_w[2 * d_model:])
        bq = (in_b[:d_model] * scale).reshape(nhead, 1, hd)
        bk = in_b[d_model:2 * d_model].reshape(nhead, 1, hd)
        bv = in_b[2 * d_model:].reshape(nhead, 1, hd)

        out_w = jnp.asarray(rp["out_proj_w"], jnp.float32)
        out_b = jnp.asarray(rp["out_proj_b"], jnp.float32).reshape(-1)
        lin_w = jnp.asarray(rp["lin_w"], jnp.float32)
        lin_b = jnp.asarray(rp["lin_b"], jnp.float32).reshape(-1)
        wf = (lin_w @ out_w).T.reshape(nhead, hd, d_model)          # fused out_proj + Linear
        bf = (out_b @ lin_w.T + lin_b).reshape(1, d_model)

        lnw = jnp.asarray(rp["ln_w"], jnp.float32).reshape(1, d_model)
        lnb = jnp.asarray(rp["ln_b"], jnp.float32).reshape(1, d_model)
        return dict(wq=wq, wk=wk, wv=wv, bq=bq, bk=bk, bv=bv,
                    wf=wf, bf=bf, lnw=lnw, lnb=lnb)

    per = [per_layer(rp) for rp in raw_layer_params]
    stacked = {}
    for key in per[0]:
        arr = jnp.stack([p[key] for p in per], axis=0)              # leading nlayers axis
        if key in ("wq", "wk", "wv", "wf"):
            arr = arr.astype(jnp.bfloat16)                          # bf16 MXU operands
        stacked[key] = arr
    return stacked


# ----------------------------- VMEM-aware tiling -----------------------------

def _tpu_vmem_bytes():
    try:
        return int(pltpu.get_tpu_info().vmem_capacity_bytes)
    except Exception:
        return 64 * 1024 * 1024       # conservative (v7x per-TC capacity)


def _pick_batch_block(batch, seq, d_model, vmem_bytes):
    """Largest batch block whose f32 working set (resident activation + aw accumulator +
    temps + double-buffered I/O blocks) fits the generation-aware VMEM budget.  Only
    split into >=2 grid steps (v7x: 2 TCs) when every step still packs >=512 rows."""
    per_b = 4 * (16 * seq * d_model + 8 * seq * seq)
    budget = int(vmem_bytes * 0.55)
    fit = [d for d in range(1, batch + 1) if batch % d == 0 and d * per_b <= budget]
    if not fit:
        return 1
    split = [d for d in fit if (batch // d) >= 2 and d * seq >= 512]
    return split[-1] if split else fit[-1]


# ----------------------------- wrapper -----------------------------

def transformer_cate_encoder(src, pos, raw_layer_params, *, nhead, batch_block=None):
    """TransformerCATEEncoder.forward (norm=None, return_intermediate=False, masks=None).
    src, pos: (B, L, D).  Returns (output (B, L, D), attn_weights (B, L, L))."""
    batch, seq, d_model = src.shape
    assert d_model % nhead == 0
    nlayers = len(raw_layer_params)
    params = prepare_stacked_params(raw_layer_params, nhead=nhead)

    vmem_bytes = _tpu_vmem_bytes()
    bt = batch_block if batch_block is not None else _pick_batch_block(
        batch, seq, d_model, vmem_bytes)
    assert batch % bt == 0
    nb = batch // bt
    vmem_limit = max(32 * 1024 * 1024, min(int(vmem_bytes * 3 // 4), 96 * 1024 * 1024))

    act_spec = pl.BlockSpec((bt, seq, d_model), lambda i, l: (i, 0, 0))
    aw_spec = pl.BlockSpec((bt, seq, seq), lambda i, l: (i, 0, 0))

    def wspec(arr):
        # One layer's weights per grid step, selected by the layer grid index.
        shp = arr.shape
        return pl.BlockSpec((1,) + shp[1:], lambda i, l: (l,) + (0,) * (len(shp) - 1))

    kernel = functools.partial(_fused_encoder_kernel, nhead=nhead, nlayers=nlayers)

    out, aw = pl.pallas_call(
        kernel,
        out_shape=(jax.ShapeDtypeStruct((batch, seq, d_model), src.dtype),
                   jax.ShapeDtypeStruct((batch, seq, seq), jnp.float32)),
        grid=(nb, nlayers),
        in_specs=[
            act_spec, act_spec,
            wspec(params["wq"]), wspec(params["wk"]), wspec(params["wv"]),
            wspec(params["bq"]), wspec(params["bk"]), wspec(params["bv"]),
            wspec(params["wf"]), wspec(params["bf"]),
            wspec(params["lnw"]), wspec(params["lnb"]),
        ],
        out_specs=(act_spec, aw_spec),
        scratch_shapes=[pltpu.VMEM((bt, seq, d_model), jnp.float32),   # resident activation
                        pltpu.VMEM((bt, seq, seq), jnp.float32)],      # attn-weight accumulator
        compiler_params=pltpu.CompilerParams(
            dimension_semantics=("parallel", "arbitrary"),
            vmem_limit_bytes=vmem_limit),
    )(src, pos,
      params["wq"], params["wk"], params["wv"],
      params["bq"], params["bk"], params["bv"],
      params["wf"], params["bf"], params["lnw"], params["lnb"])
    return out, aw


# ----------------------------- pure-JAX reference -----------------------------

def reference_encoder(src, pos, raw_layer_params, *, nhead):
    batch, seq, d_model = src.shape
    hd = d_model // nhead
    scale = 1.0 / math.sqrt(hd)
    out = src.astype(jnp.float32)
    posf = pos.astype(jnp.float32)
    aw_sum = None
    for rp in raw_layer_params:
        in_w = rp["in_proj_w"]
        in_b = rp["in_proj_b"].reshape(-1)
        qk_in = out + posf
        q = qk_in @ in_w[:d_model].T + in_b[:d_model]
        k = qk_in @ in_w[d_model:2 * d_model].T + in_b[d_model:2 * d_model]
        v = out @ in_w[2 * d_model:].T + in_b[2 * d_model:]

        def split(x):
            return x.reshape(batch, seq, nhead, hd).transpose(0, 2, 1, 3)

        qh, kh, vh = split(q), split(k), split(v)
        s = jnp.einsum('bhld,bhmd->bhlm', qh * scale, kh)
        p = jax.nn.softmax(s, axis=-1)
        a = jnp.einsum('bhlm,bhmd->bhld', p, vh)
        attn = a.transpose(0, 2, 1, 3).reshape(batch, seq, d_model)
        aw = p.mean(axis=1)                                   # (B, L, L), head-averaged

        attn_out = attn @ rp["out_proj_w"].T + rp["out_proj_b"].reshape(-1)
        src2 = attn_out @ rp["lin_w"].T + rp["lin_b"].reshape(-1)
        x = out + src2
        mean = x.mean(-1, keepdims=True)
        var = ((x - mean) ** 2).mean(-1, keepdims=True)
        out = (x - mean) / jnp.sqrt(var + 1e-5) * rp["ln_w"].reshape(-1) + rp["ln_b"].reshape(-1)
        aw_sum = aw if aw_sum is None else aw_sum + aw
    return out, aw_sum / float(len(raw_layer_params))


# ----------------------------- demo / self-test -----------------------------

if __name__ == "__main__":
    B, L, D, NHEAD, NLAYERS = 2, 8, 32, 4, 2

    key = jax.random.PRNGKey(0)
    raw_layers = []
    for _ in range(NLAYERS):
        key, *ks = jax.random.split(key, 9)
        raw_layers.append({
            "in_proj_w":  jax.random.normal(ks[0], (3 * D, D), jnp.float32) * 0.1,
            "in_proj_b":  jax.random.normal(ks[1], (1, 3 * D), jnp.float32) * 0.1,
            "out_proj_w": jax.random.normal(ks[2], (D, D), jnp.float32) * 0.1,
            "out_proj_b": jax.random.normal(ks[3], (1, D), jnp.float32) * 0.1,
            "lin_w":      jax.random.normal(ks[4], (D, D), jnp.float32) * 0.1,
            "lin_b":      jax.random.normal(ks[5], (1, D), jnp.float32) * 0.1,
            "ln_w":       1.0 + jax.random.normal(ks[6], (1, D), jnp.float32) * 0.05,
            "ln_b":       jax.random.normal(ks[7], (1, D), jnp.float32) * 0.05,
        })
    key, k_src, k_pos = jax.random.split(key, 3)
    src = jax.random.normal(k_src, (B, L, D), jnp.float32)   # batch-first (B, L, D)
    pos = jax.random.normal(k_pos, (B, L, D), jnp.float32)

    out, attn_w = transformer_cate_encoder(src, pos, raw_layers, nhead=NHEAD)
    out = jax.block_until_ready(out)
    attn_w = jax.block_until_ready(attn_w)

    ref_out, ref_aw = reference_encoder(src, pos, raw_layers, nhead=NHEAD)

    assert out.shape == (B, L, D), out.shape
    assert attn_w.shape == (B, L, L), attn_w.shape
    err_out = float(jnp.max(jnp.abs(out - ref_out)))
    err_aw = float(jnp.max(jnp.abs(attn_w - ref_aw)))
    # bf16 MXU operands (f32 accumulation) -> slightly looser tolerance than pure f32.
    assert jnp.allclose(out, ref_out, atol=3e-2, rtol=3e-2), err_out
    assert jnp.allclose(attn_w, ref_aw, atol=3e-2, rtol=3e-2), err_aw

    print("KERNEL_OK")
</pallas_src>

<mosaic_0001>
module attributes {stable_mosaic.version = 11 : i64} {
  func.func @_fused_encoder_kernel(%arg0: i32, %arg1: i32, %arg2: memref<2x8x32xf32, #tpu.memory_space<vmem>>, %arg3: memref<2x8x32xf32, #tpu.memory_space<vmem>>, %arg4: memref<1x4x32x8xbf16, #tpu.memory_space<vmem>>, %arg5: memref<1x4x32x8xbf16, #tpu.memory_space<vmem>>, %arg6: memref<1x4x32x8xbf16, #tpu.memory_space<vmem>>, %arg7: memref<1x4x1x8xf32, #tpu.memory_space<vmem>>, %arg8: memref<1x4x1x8xf32, #tpu.memory_space<vmem>>, %arg9: memref<1x4x1x8xf32, #tpu.memory_space<vmem>>, %arg10: memref<1x4x8x32xbf16, #tpu.memory_space<vmem>>, %arg11: memref<1x1x32xf32, #tpu.memory_space<vmem>>, %arg12: memref<1x1x32xf32, #tpu.memory_space<vmem>>, %arg13: memref<1x1x32xf32, #tpu.memory_space<vmem>>, %arg14: memref<2x8x32xf32, #tpu.memory_space<vmem>>, %arg15: memref<2x8x8xf32, #tpu.memory_space<vmem>>, %arg16: memref<2x8x32xf32, #tpu.memory_space<vmem>>, %arg17: memref<2x8x8xf32, #tpu.memory_space<vmem>>) attributes {dimension_semantics = [#tpu.dimension_semantics<parallel>, #tpu.dimension_semantics<arbitrary>], iteration_bounds = array<i64: 1, 2>, scalar_prefetch = 0 : i64, scratch_operands = 2 : i64, tpu.core_type = #tpu.core_type<tc>, window_params = [{transform_indices = @transform_0, window_bounds = array<i64: 2, 8, 32>}, {transform_indices = @transform_1, window_bounds = array<i64: 2, 8, 32>}, {transform_indices = @transform_2, window_bounds = array<i64: 1, 4, 32, 8>}, {transform_indices = @transform_3, window_bounds = array<i64: 1, 4, 32, 8>}, {transform_indices = @transform_4, window_bounds = array<i64: 1, 4, 32, 8>}, {transform_indices = @transform_5, window_bounds = array<i64: 1, 4, 1, 8>}, {transform_indices = @transform_6, window_bounds = array<i64: 1, 4, 1, 8>}, {transform_indices = @transform_7, window_bounds = array<i64: 1, 4, 1, 8>}, {transform_indices = @transform_8, window_bounds = array<i64: 1, 4, 8, 32>}, {transform_indices = @transform_9, window_bounds = array<i64: 1, 1, 32>}, {transform_indices = @transform_10, window_bounds = array<i64: 1, 1, 32>}, {transform_indices = @transform_11, window_bounds = array<i64: 1, 1, 32>}, {transform_indices = @transform_12, window_bounds = array<i64: 2, 8, 32>}, {transform_indices = @transform_13, window_bounds = array<i64: 2, 8, 8>}]} {
    %c0_i32 = arith.constant 0 : i32
    %0 = arith.cmpi eq, %arg1, %c0_i32 : i32
    %1 = arith.extui %0 : i1 to i32
    %c0_i32_0 = arith.constant 0 : i32
    %2 = arith.cmpi ne, %1, %c0_i32_0 : i32
    scf.if %2 {
      %c0_91 = arith.constant 0 : index
      %c0_92 = arith.constant 0 : index
      %c0_93 = arith.constant 0 : index
      %253 = vector.load %arg2[%c0_91, %c0_92, %c0_93] : memref<2x8x32xf32, #tpu.memory_space<vmem>>, vector<2x8x32xf32>
      %c0_94 = arith.constant 0 : index
      %c0_95 = arith.constant 0 : index
      %c0_96 = arith.constant 0 : index
      %254 = vector.load %arg16[%c0_94, %c0_95, %c0_96] : memref<2x8x32xf32, #tpu.memory_space<vmem>>, vector<2x8x32xf32>
      tpu.vector_store %arg16[%c0_94, %c0_95, %c0_96], %253 {strides = array<i32>} : memref<2x8x32xf32, #tpu.memory_space<vmem>>, vector<2x8x32xf32>,
      %cst_97 = arith.constant 0.000000e+00 : f32
      %255 = vector.broadcast %cst_97 : f32 to vector<2x8x8xf32>
      %c0_98 = arith.constant 0 : index
      %c0_99 = arith.constant 0 : index
      %c0_100 = arith.constant 0 : index
      %256 = vector.load %arg17[%c0_98, %c0_99, %c0_100] : memref<2x8x8xf32, #tpu.memory_space<vmem>>, vector<2x8x8xf32>
      tpu.vector_store %arg17[%c0_98, %c0_99, %c0_100], %255 {strides = array<i32>} : memref<2x8x8xf32, #tpu.memory_space<vmem>>, vector<2x8x8xf32>,
    } else {
    }
    %c0 = arith.constant 0 : index
    %c0_1 = arith.constant 0 : index
    %c0_2 = arith.constant 0 : index
    %3 = vector.load %arg16[%c0, %c0_1, %c0_2] : memref<2x8x32xf32, #tpu.memory_space<vmem>>, vector<2x8x32xf32>
    %c0_3 = arith.constant 0 : index
    %c0_4 = arith.constant 0 : index
    %c0_5 = arith.constant 0 : index
    %4 = vector.load %arg3[%c0_3, %c0_4, %c0_5] : memref<2x8x32xf32, #tpu.memory_space<vmem>>, vector<2x8x32xf32>
    %5 = vector.shape_cast %3 : vector<2x8x32xf32> to vector<16x32xf32>
    %6 = arith.addf %3, %4 : vector<2x8x32xf32>
    %7 = vector.shape_cast %6 : vector<2x8x32xf32> to vector<16x32xf32>
    %8 = arith.truncf %5 : vector<16x32xf32> to vector<16x32xbf16>
    %9 = arith.truncf %7 : vector<16x32xf32> to vector<16x32xbf16>
    %c0_6 = arith.constant 0 : index
    %c0_7 = arith.constant 0 : index
    %c0_8 = arith.constant 0 : index
    %c0_9 = arith.constant 0 : index
    %10 = vector.load %arg4[%c0_6, %c0_7, %c0_8, %c0_9] : memref<1x4x32x8xbf16, #tpu.memory_space<vmem>>, vector<1x4x32x8xbf16>
    %11 = vector.shape_cast %10 : vector<1x4x32x8xbf16> to vector<4x32x8xbf16>
    %c0_10 = arith.constant 0 : index
    %c0_11 = arith.constant 0 : index
    %c0_12 = arith.constant 0 : index
    %c0_13 = arith.constant 0 : index
    %12 = vector.load %arg5[%c0_10, %c0_11, %c0_12, %c0_13] : memref<1x4x32x8xbf16, #tpu.memory_space<vmem>>, vector<1x4x32x8xbf16>
    %13 = vector.shape_cast %12 : vector<1x4x32x8xbf16> to vector<4x32x8xbf16>
    %c0_14 = arith.constant 0 : index
    %c0_15 = arith.constant 0 : index
    %c0_16 = arith.constant 0 : index
    %c0_17 = arith.constant 0 : index
    %14 = vector.load %arg6[%c0_14, %c0_15, %c0_16, %c0_17] : memref<1x4x32x8xbf16, #tpu.memory_space<vmem>>, vector<1x4x32x8xbf16>
    %15 = vector.shape_cast %14 : vector<1x4x32x8xbf16> to vector<4x32x8xbf16>
    %c0_18 = arith.constant 0 : index
    %c0_19 = arith.constant 0 : index
    %c0_20 = arith.constant 0 : index
    %c0_21 = arith.constant 0 : index
    %16 = vector.load %arg7[%c0_18, %c0_19, %c0_20, %c0_21] : memref<1x4x1x8xf32, #tpu.memory_space<vmem>>, vector<1x4x1x8xf32>
    %17 = vector.shape_cast %16 : vector<1x4x1x8xf32> to vector<4x1x8xf32>
    %c0_22 = arith.constant 0 : index
    %c0_23 = arith.constant 0 : index
    %c0_24 = arith.constant 0 : index
    %c0_25 = arith.constant 0 : index
    %18 = vector.load %arg8[%c0_22, %c0_23, %c0_24, %c0_25] : memref<1x4x1x8xf32, #tpu.memory_space<vmem>>, vector<1x4x1x8xf32>
    %19 = vector.shape_cast %18 : vector<1x4x1x8xf32> to vector<4x1x8xf32>
    %c0_26 = arith.constant 0 : index
    %c0_27 = arith.constant 0 : index
    %c0_28 = arith.constant 0 : index
    %c0_29 = arith.constant 0 : index
    %20 = vector.load %arg9[%c0_26, %c0_27, %c0_28, %c0_29] : memref<1x4x1x8xf32, #tpu.memory_space<vmem>>, vector<1x4x1x8xf32>
    %21 = vector.shape_cast %20 : vector<1x4x1x8xf32> to vector<4x1x8xf32>
    %c0_30 = arith.constant 0 : index
    %c0_31 = arith.constant 0 : index
    %c0_32 = arith.constant 0 : index
    %c0_33 = arith.constant 0 : index
    %22 = vector.load %arg10[%c0_30, %c0_31, %c0_32, %c0_33] : memref<1x4x8x32xbf16, #tpu.memory_space<vmem>>, vector<1x4x8x32xbf16>
    %23 = vector.shape_cast %22 : vector<1x4x8x32xbf16> to vector<4x8x32xbf16>
    %cst = arith.constant 0.000000e+00 : f32
    %24 = vector.broadcast %cst : f32 to vector<16x32xf32>
    %cst_34 = arith.constant 0.000000e+00 : f32
    %25 = vector.broadcast %cst_34 : f32 to vector<2x8x8xf32>
    %26 = vector.extract_strided_slice %11 {offsets = [0, 0, 0], sizes = [1, 32, 8], strides = [1, 1, 1]} : vector<4x32x8xbf16> to vector<1x32x8xbf16>
    %27 = vector.shape_cast %26 : vector<1x32x8xbf16> to vector<32x8xbf16>
    %cst_35 = arith.constant dense<0.000000e+00> : vector<16x8xf32>
    %28 = tpu.matmul %9, %27, %cst_35 {dimension_numbers = #tpu.dot_dimension_numbers<[1], [0], [0], [1], [0, 0, 1, 1], [], []>} : vector<16x32xbf16>, vector<32x8xbf16>, vector<16x8xf32> -> vector<16x8xf32>
    %29 = vector.extract_strided_slice %17 {offsets = [0, 0, 0], sizes = [1, 1, 8], strides = [1, 1, 1]} : vector<4x1x8xf32> to vector<1x1x8xf32>
    %30 = vector.shape_cast %29 : vector<1x1x8xf32> to vector<1x8xf32>
    %31 = vector.broadcast %30 : vector<1x8xf32> to vector<16x8xf32>
    %32 = arith.addf %28, %31 : vector<16x8xf32>
    %33 = vector.shape_cast %32 : vector<16x8xf32> to vector<2x8x8xf32>
    %34 = vector.extract_strided_slice %13 {offsets = [0, 0, 0], sizes = [1, 32, 8], strides = [1, 1, 1]} : vector<4x32x8xbf16> to vector<1x32x8xbf16>
    %35 = vector.shape_cast %34 : vector<1x32x8xbf16> to vector<32x8xbf16>
    %cst_36 = arith.constant dense<0.000000e+00> : vector<16x8xf32>
    %36 = tpu.matmul %9, %35, %cst_36 {dimension_numbers = #tpu.dot_dimension_numbers<[1], [0], [0], [1], [0, 0, 1, 1], [], []>} : vector<16x32xbf16>, vector<32x8xbf16>, vector<16x8xf32> -> vector<16x8xf32>
    %37 = vector.extract_strided_slice %19 {offsets = [0, 0, 0], sizes = [1, 1, 8], strides = [1, 1, 1]} : vector<4x1x8xf32> to vector<1x1x8xf32>
    %38 = vector.shape_cast %37 : vector<1x1x8xf32> to vector<1x8xf32>
    %39 = vector.broadcast %38 : vector<1x8xf32> to vector<16x8xf32>
    %40 = arith.addf %36, %39 : vector<16x8xf32>
    %41 = vector.shape_cast %40 : vector<16x8xf32> to vector<2x8x8xf32>
    %42 = vector.extract_strided_slice %15 {offsets = [0, 0, 0], sizes = [1, 32, 8], strides = [1, 1, 1]} : vector<4x32x8xbf16> to vector<1x32x8xbf16>
    %43 = vector.shape_cast %42 : vector<1x32x8xbf16> to vector<32x8xbf16>
    %cst_37 = arith.constant dense<0.000000e+00> : vector<16x8xf32>
    %44 = tpu.matmul %8, %43, %cst_37 {dimension_numbers = #tpu.dot_dimension_numbers<[1], [0], [0], [1], [0, 0, 1, 1], [], []>} : vector<16x32xbf16>, vector<32x8xbf16>, vector<16x8xf32> -> vector<16x8xf32>
    %45 = vector.extract_strided_slice %21 {offsets = [0, 0, 0], sizes = [1, 1, 8], strides = [1, 1, 1]} : vector<4x1x8xf32> to vector<1x1x8xf32>
    %46 = vector.shape_cast %45 : vector<1x1x8xf32> to vector<1x8xf32>
    %47 = vector.broadcast %46 : vector<1x8xf32> to vector<16x8xf32>
    %48 = arith.addf %44, %47 : vector<16x8xf32>
    %49 = vector.shape_cast %48 : vector<16x8xf32> to vector<2x8x8xf32>
    %50 = arith.truncf %33 : vector<2x8x8xf32> to vector<2x8x8xbf16>
    %51 = arith.truncf %41 : vector<2x8x8xf32> to vector<2x8x8xbf16>
    "tpu.trace_start"() <{level = 10 : i32, message = "bld,bmd->blm"}> : () -> ()
    %cst_38 = arith.constant dense<0.000000e+00> : vector<2x8x8xf32>
    %52 = tpu.matmul %50, %51, %cst_38 {dimension_numbers = #tpu.dot_dimension_numbers<[2], [2], [1], [1], [0, 0, 0, 1, 1, 1], [0], [0]>} : vector<2x8x8xbf16>, vector<2x8x8xbf16>, vector<2x8x8xf32> -> vector<2x8x8xf32>
    "tpu.trace_stop"() : () -> ()
    %cst_39 = arith.constant dense<0xFF800000> : vector<2x8xf32>
    %53 = vector.multi_reduction <maximumf>, %52, %cst_39 [2] : vector<2x8x8xf32> to vector<2x8xf32>
    %54 = vector.shape_cast %53 : vector<2x8xf32> to vector<2x8x1xf32>
    %55 = vector.broadcast %54 : vector<2x8x1xf32> to vector<2x8x8xf32>
    %56 = arith.subf %52, %55 : vector<2x8x8xf32>
    %57 = math.exp %56 : vector<2x8x8xf32>
    %cst_40 = arith.constant dense<0.000000e+00> : vector<2x8xf32>
    %58 = vector.multi_reduction <add>, %57, %cst_40 [2] : vector<2x8x8xf32> to vector<2x8xf32>
    %59 = vector.shape_cast %58 : vector<2x8xf32> to vector<2x8x1xf32>
    %60 = tpu.reciprocal %59 : vector<2x8x1xf32> -> vector<2x8x1xf32>
    %61 = vector.broadcast %60 : vector<2x8x1xf32> to vector<2x8x8xf32>
    %62 = arith.mulf %57, %61 : vector<2x8x8xf32>
    %63 = arith.addf %25, %62 : vector<2x8x8xf32>
    %64 = arith.truncf %62 : vector<2x8x8xf32> to vector<2x8x8xbf16>
    %65 = arith.truncf %49 : vector<2x8x8xf32> to vector<2x8x8xbf16>
    "tpu.trace_start"() <{level = 10 : i32, message = "blm,bmd->bld"}> : () -> ()
    %cst_41 = arith.constant dense<0.000000e+00> : vector<2x8x8xf32>
    %66 = tpu.matmul %64, %65, %cst_41 {dimension_numbers = #tpu.dot_dimension_numbers<[2], [1], [1], [2], [0, 0, 0, 1, 1, 2], [0], [0]>} : vector<2x8x8xbf16>, vector<2x8x8xbf16>, vector<2x8x8xf32> -> vector<2x8x8xf32>
    "tpu.trace_stop"() : () -> ()
    %67 = vector.shape_cast %66 : vector<2x8x8xf32> to vector<16x8xf32>
    %68 = arith.truncf %67 : vector<16x8xf32> to vector<16x8xbf16>
    %69 = vector.extract_strided_slice %23 {offsets = [0, 0, 0], sizes = [1, 8, 32], strides = [1, 1, 1]} : vector<4x8x32xbf16> to vector<1x8x32xbf16>
    %70 = vector.shape_cast %69 : vector<1x8x32xbf16> to vector<8x32xbf16>
    %cst_42 = arith.constant dense<0.000000e+00> : vector<16x32xf32>
    %71 = tpu.matmul %68, %70, %cst_42 {dimension_numbers = #tpu.dot_dimension_numbers<[1], [0], [0], [1], [0, 0, 1, 1], [], []>} : vector<16x8xbf16>, vector<8x32xbf16>, vector<16x32xf32> -> vector<16x32xf32>
    %72 = arith.addf %24, %71 : vector<16x32xf32>
    %73 = vector.extract_strided_slice %11 {offsets = [1, 0, 0], sizes = [1, 32, 8], strides = [1, 1, 1]} : vector<4x32x8xbf16> to vector<1x32x8xbf16>
    %74 = vector.shape_cast %73 : vector<1x32x8xbf16> to vector<32x8xbf16>
    %cst_43 = arith.constant dense<0.000000e+00> : vector<16x8xf32>
    %75 = tpu.matmul %9, %74, %cst_43 {dimension_numbers = #tpu.dot_dimension_numbers<[1], [0], [0], [1], [0, 0, 1, 1], [], []>} : vector<16x32xbf16>, vector<32x8xbf16>, vector<16x8xf32> -> vector<16x8xf32>
    %76 = vector.extract_strided_slice %17 {offsets = [1, 0, 0], sizes = [1, 1, 8], strides = [1, 1, 1]} : vector<4x1x8xf32> to vector<1x1x8xf32>
    %77 = vector.shape_cast %76 : vector<1x1x8xf32> to vector<1x8xf32>
    %78 = vector.broadcast %77 : vector<1x8xf32> to vector<16x8xf32>
    %79 = arith.addf %75, %78 : vector<16x8xf32>
    %80 = vector.shape_cast %79 : vector<16x8xf32> to vector<2x8x8xf32>
    %81 = vector.extract_strided_slice %13 {offsets = [1, 0, 0], sizes = [1, 32, 8], strides = [1, 1, 1]} : vector<4x32x8xbf16> to vector<1x32x8xbf16>
    %82 = vector.shape_cast %81 : vector<1x32x8xbf16> to vector<32x8xbf16>
    %cst_44 = arith.constant dense<0.000000e+00> : vector<16x8xf32>
    %83 = tpu.matmul %9, %82, %cst_44 {dimension_numbers = #tpu.dot_dimension_numbers<[1], [0], [0], [1], [0, 0, 1, 1], [], []>} : vector<16x32xbf16>, vector<32x8xbf16>, vector<16x8xf32> -> vector<16x8xf32>
    %84 = vector.extract_strided_slice %19 {offsets = [1, 0, 0], sizes = [1, 1, 8], strides = [1, 1, 1]} : vector<4x1x8xf32> to vector<1x1x8xf32>
    %85 = vector.shape_cast %84 : vector<1x1x8xf32> to vector<1x8xf32>
    %86 = vector.broadcast %85 : vector<1x8xf32> to vector<16x8xf32>
    %87 = arith.addf %83, %86 : vector<16x8xf32>
    %88 = vector.shape_cast %87 : vector<16x8xf32> to vector<2x8x8xf32>
    %89 = vector.extract_strided_slice %15 {offsets = [1, 0, 0], sizes = [1, 32, 8], strides = [1, 1, 1]} : vector<4x32x8xbf16> to vector<1x32x8xbf16>
    %90 = vector.shape_cast %89 : vector<1x32x8xbf16> to vector<32x8xbf16>
    %cst_45 = arith.constant dense<0.000000e+00> : vector<16x8xf32>
    %91 = tpu.matmul %8, %90, %cst_45 {dimension_numbers = #tpu.dot_dimension_numbers<[1], [0], [0], [1], [0, 0, 1, 1], [], []>} : vector<16x32xbf16>, vector<32x8xbf16>, vector<16x8xf32> -> vector<16x8xf32>
    %92 = vector.extract_strided_slice %21 {offsets = [1, 0, 0], sizes = [1, 1, 8], strides = [1, 1, 1]} : vector<4x1x8xf32> to vector<1x1x8xf32>
    %93 = vector.shape_cast %92 : vector<1x1x8xf32> to vector<1x8xf32>
    %94 = vector.broadcast %93 : vector<1x8xf32> to vector<16x8xf32>
    %95 = arith.addf %91, %94 : vector<16x8xf32>
    %96 = vector.shape_cast %95 : vector<16x8xf32> to vector<2x8x8xf32>
    %97 = arith.truncf %80 : vector<2x8x8xf32> to vector<2x8x8xbf16>
    %98 = arith.truncf %88 : vector<2x8x8xf32> to vector<2x8x8xbf16>
    "tpu.trace_start"() <{level = 10 : i32, message = "bld,bmd->blm"}> : () -> ()
    %cst_46 = arith.constant dense<0.000000e+00> : vector<2x8x8xf32>
    %99 = tpu.matmul %97, %98, %cst_46 {dimension_numbers = #tpu.dot_dimension_numbers<[2], [2], [1], [1], [0, 0, 0, 1, 1, 1], [0], [0]>} : vector<2x8x8xbf16>, vector<2x8x8xbf16>, vector<2x8x8xf32> -> vector<2x8x8xf32>
    "tpu.trace_stop"() : () -> ()
    %cst_47 = arith.constant dense<0xFF800000> : vector<2x8xf32>
    %100 = vector.multi_reduction <maximumf>, %99, %cst_47 [2] : vector<2x8x8xf32> to vector<2x8xf32>
    %101 = vector.shape_cast %100 : vector<2x8xf32> to vector<2x8x1xf32>
    %102 = vector.broadcast %101 : vector<2x8x1xf32> to vector<2x8x8xf32>
    %103 = arith.subf %99, %102 : vector<2x8x8xf32>
    %104 = math.exp %103 : vector<2x8x8xf32>
    %cst_48 = arith.constant dense<0.000000e+00> : vector<2x8xf32>
    %105 = vector.multi_reduction <add>, %104, %cst_48 [2] : vector<2x8x8xf32> to vector<2x8xf32>
    %106 = vector.shape_cast %105 : vector<2x8xf32> to vector<2x8x1xf32>
    %107 = tpu.reciprocal %106 : vector<2x8x1xf32> -> vector<2x8x1xf32>
    %108 = vector.broadcast %107 : vector<2x8x1xf32> to vector<2x8x8xf32>
    %109 = arith.mulf %104, %108 : vector<2x8x8xf32>
    %110 = arith.addf %63, %109 : vector<2x8x8xf32>
    %111 = arith.truncf %109 : vector<2x8x8xf32> to vector<2x8x8xbf16>
    %112 = arith.truncf %96 : vector<2x8x8xf32> to vector<2x8x8xbf16>
    "tpu.trace_start"() <{level = 10 : i32, message = "blm,bmd->bld"}> : () -> ()
    %cst_49 = arith.constant dense<0.000000e+00> : vector<2x8x8xf32>
    %113 = tpu.matmul %111, %112, %cst_49 {dimension_numbers = #tpu.dot_dimension_numbers<[2], [1], [1], [2], [0, 0, 0, 1, 1, 2], [0], [0]>} : vector<2x8x8xbf16>, vector<2x8x8xbf16>, vector<2x8x8xf32> -> vector<2x8x8xf32>
    "tpu.trace_stop"() : () -> ()
    %114 = vector.shape_cast %113 : vector<2x8x8xf32> to vector<16x8xf32>
    %115 = arith.truncf %114 : vector<16x8xf32> to vector<16x8xbf16>
    %116 = vector.extract_strided_slice %23 {offsets = [1, 0, 0], sizes = [1, 8, 32], strides = [1, 1, 1]} : vector<4x8x32xbf16> to vector<1x8x32xbf16>
    %117 = vector.shape_cast %116 : vector<1x8x32xbf16> to vector<8x32xbf16>
    %cst_50 = arith.constant dense<0.000000e+00> : vector<16x32xf32>
    %118 = tpu.matmul %115, %117, %cst_50 {dimension_numbers = #tpu.dot_dimension_numbers<[1], [0], [0], [1], [0, 0, 1, 1], [], []>} : vector<16x8xbf16>, vector<8x32xbf16>, vector<16x32xf32> -> vector<16x32xf32>
    %119 = arith.addf %72, %118 : vector<16x32xf32>
    %120 = vector.extract_strided_slice %11 {offsets = [2, 0, 0], sizes = [1, 32, 8], strides = [1, 1, 1]} : vector<4x32x8xbf16> to vector<1x32x8xbf16>
    %121 = vector.shape_cast %120 : vector<1x32x8xbf16> to vector<32x8xbf16>
    %cst_51 = arith.constant dense<0.000000e+00> : vector<16x8xf32>
    %122 = tpu.matmul %9, %121, %cst_51 {dimension_numbers = #tpu.dot_dimension_numbers<[1], [0], [0], [1], [0, 0, 1, 1], [], []>} : vector<16x32xbf16>, vector<32x8xbf16>, vector<16x8xf32> -> vector<16x8xf32>
    %123 = vector.extract_strided_slice %17 {offsets = [2, 0, 0], sizes = [1, 1, 8], strides = [1, 1, 1]} : vector<4x1x8xf32> to vector<1x1x8xf32>
    %124 = vector.shape_cast %123 : vector<1x1x8xf32> to vector<1x8xf32>
    %125 = vector.broadcast %124 : vector<1x8xf32> to vector<16x8xf32>
    %126 = arith.addf %122, %125 : vector<16x8xf32>
    %127 = vector.shape_cast %126 : vector<16x8xf32> to vector<2x8x8xf32>
    %128 = vector.extract_strided_slice %13 {offsets = [2, 0, 0], sizes = [1, 32, 8], strides = [1, 1, 1]} : vector<4x32x8xbf16> to vector<1x32x8xbf16>
    %129 = vector.shape_cast %128 : vector<1x32x8xbf16> to vector<32x8xbf16>
    %cst_52 = arith.constant dense<0.000000e+00> : vector<16x8xf32>
    %130 = tpu.matmul %9, %129, %cst_52 {dimension_numbers = #tpu.dot_dimension_numbers<[1], [0], [0], [1], [0, 0, 1, 1], [], []>} : vector<16x32xbf16>, vector<32x8xbf16>, vector<16x8xf32> -> vector<16x8xf32>
    %131 = vector.extract_strided_slice %19 {offsets = [2, 0, 0], sizes = [1, 1, 8], strides = [1, 1, 1]} : vector<4x1x8xf32> to vector<1x1x8xf32>
    %132 = vector.shape_cast %131 : vector<1x1x8xf32> to vector<1x8xf32>
    %133 = vector.broadcast %132 : vector<1x8xf32> to vector<16x8xf32>
    %134 = arith.addf %130, %133 : vector<16x8xf32>
    %135 = vector.shape_cast %134 : vector<16x8xf32> to vector<2x8x8xf32>
    %136 = vector.extract_strided_slice %15 {offsets = [2, 0, 0], sizes = [1, 32, 8], strides = [1, 1, 1]} : vector<4x32x8xbf16> to vector<1x32x8xbf16>
    %137 = vector.shape_cast %136 : vector<1x32x8xbf16> to vector<32x8xbf16>
    %cst_53 = arith.constant dense<0.000000e+00> : vector<16x8xf32>
    %138 = tpu.matmul %8, %137, %cst_53 {dimension_numbers = #tpu.dot_dimension_numbers<[1], [0], [0], [1], [0, 0, 1, 1], [], []>} : vector<16x32xbf16>, vector<32x8xbf16>, vector<16x8xf32> -> vector<16x8xf32>
    %139 = vector.extract_strided_slice %21 {offsets = [2, 0, 0], sizes = [1, 1, 8], strides = [1, 1, 1]} : vector<4x1x8xf32> to vector<1x1x8xf32>
    %140 = vector.shape_cast %139 : vector<1x1x8xf32> to vector<1x8xf32>
    %141 = vector.broadcast %140 : vector<1x8xf32> to vector<16x8xf32>
    %142 = arith.addf %138, %141 : vector<16x8xf32>
    %143 = vector.shape_cast %142 : vector<16x8xf32> to vector<2x8x8xf32>
    %144 = arith.truncf %127 : vector<2x8x8xf32> to vector<2x8x8xbf16>
    %145 = arith.truncf %135 : vector<2x8x8xf32> to vector<2x8x8xbf16>
    "tpu.trace_start"() <{level = 10 : i32, message = "bld,bmd->blm"}> : () -> ()
    %cst_54 = arith.constant dense<0.000000e+00> : vector<2x8x8xf32>
    %146 = tpu.matmul %144, %145, %cst_54 {dimension_numbers = #tpu.dot_dimension_numbers<[2], [2], [1], [1], [0, 0, 0, 1, 1, 1], [0], [0]>} : vector<2x8x8xbf16>, vector<2x8x8xbf16>, vector<2x8x8xf32> -> vector<2x8x8xf32>
    "tpu.trace_stop"() : () -> ()
    %cst_55 = arith.constant dense<0xFF800000> : vector<2x8xf32>
    %147 = vector.multi_reduction <maximumf>, %146, %cst_55 [2] : vector<2x8x8xf32> to vector<2x8xf32>
    %148 = vector.shape_cast %147 : vector<2x8xf32> to vector<2x8x1xf32>
    %149 = vector.broadcast %148 : vector<2x8x1xf32> to vector<2x8x8xf32>
    %150 = arith.subf %146, %149 : vector<2x8x8xf32>
    %151 = math.exp %150 : vector<2x8x8xf32>
    %cst_56 = arith.constant dense<0.000000e+00> : vector<2x8xf32>
    %152 = vector.multi_reduction <add>, %151, %cst_56 [2] : vector<2x8x8xf32> to vector<2x8xf32>
    %153 = vector.shape_cast %152 : vector<2x8xf32> to vector<2x8x1xf32>
    %154 = tpu.reciprocal %153 : vector<2x8x1xf32> -> vector<2x8x1xf32>
    %155 = vector.broadcast %154 : vector<2x8x1xf32> to vector<2x8x8xf32>
    %156 = arith.mulf %151, %155 : vector<2x8x8xf32>
    %157 = arith.addf %110, %156 : vector<2x8x8xf32>
    %158 = arith.truncf %156 : vector<2x8x8xf32> to vector<2x8x8xbf16>
    %159 = arith.truncf %143 : vector<2x8x8xf32> to vector<2x8x8xbf16>
    "tpu.trace_start"() <{level = 10 : i32, message = "blm,bmd->bld"}> : () -> ()
    %cst_57 = arith.constant dense<0.000000e+00> : vector<2x8x8xf32>
    %160 = tpu.matmul %158, %159, %cst_57 {dimension_numbers = #tpu.dot_dimension_numbers<[2], [1], [1], [2], [0, 0, 0, 1, 1, 2], [0], [0]>} : vector<2x8x8xbf16>, vector<2x8x8xbf16>, vector<2x8x8xf32> -> vector<2x8x8xf32>
    "tpu.trace_stop"() : () -> ()
    %161 = vector.shape_cast %160 : vector<2x8x8xf32> to vector<16x8xf32>
    %162 = arith.truncf %161 : vector<16x8xf32> to vector<16x8xbf16>
    %163 = vector.extract_strided_slice %23 {offsets = [2, 0, 0], sizes = [1, 8, 32], strides = [1, 1, 1]} : vector<4x8x32xbf16> to vector<1x8x32xbf16>
    %164 = vector.shape_cast %163 : vector<1x8x32xbf16> to vector<8x32xbf16>
    %cst_58 = arith.constant dense<0.000000e+00> : vector<16x32xf32>
    %165 = tpu.matmul %162, %164, %cst_58 {dimension_numbers = #tpu.dot_dimension_numbers<[1], [0], [0], [1], [0, 0, 1, 1], [], []>} : vector<16x8xbf16>, vector<8x32xbf16>, vector<16x32xf32> -> vector<16x32xf32>
    %166 = arith.addf %119, %165 : vector<16x32xf32>
    %167 = vector.extract_strided_slice %11 {offsets = [3, 0, 0], sizes = [1, 32, 8], strides = [1, 1, 1]} : vector<4x32x8xbf16> to vector<1x32x8xbf16>
    %168 = vector.shape_cast %167 : vector<1x32x8xbf16> to vector<32x8xbf16>
    %cst_59 = arith.constant dense<0.000000e+00> : vector<16x8xf32>
    %169 = tpu.matmul %9, %168, %cst_59 {dimension_numbers = #tpu.dot_dimension_numbers<[1], [0], [0], [1], [0, 0, 1, 1], [], []>} : vector<16x32xbf16>, vector<32x8xbf16>, vector<16x8xf32> -> vector<16x8xf32>
    %170 = vector.extract_strided_slice %17 {offsets = [3, 0, 0], sizes = [1, 1, 8], strides = [1, 1, 1]} : vector<4x1x8xf32> to vector<1x1x8xf32>
    %171 = vector.shape_cast %170 : vector<1x1x8xf32> to vector<1x8xf32>
    %172 = vector.broadcast %171 : vector<1x8xf32> to vector<16x8xf32>
    %173 = arith.addf %169, %172 : vector<16x8xf32>
    %174 = vector.shape_cast %173 : vector<16x8xf32> to vector<2x8x8xf32>
    %175 = vector.extract_strided_slice %13 {offsets = [3, 0, 0], sizes = [1, 32, 8], strides = [1, 1, 1]} : vector<4x32x8xbf16> to vector<1x32x8xbf16>
    %176 = vector.shape_cast %175 : vector<1x32x8xbf16> to vector<32x8xbf16>
    %cst_60 = arith.constant dense<0.000000e+00> : vector<16x8xf32>
    %177 = tpu.matmul %9, %176, %cst_60 {dimension_numbers = #tpu.dot_dimension_numbers<[1], [0], [0], [1], [0, 0, 1, 1], [], []>} : vector<16x32xbf16>, vector<32x8xbf16>, vector<16x8xf32> -> vector<16x8xf32>
    %178 = vector.extract_strided_slice %19 {offsets = [3, 0, 0], sizes = [1, 1, 8], strides = [1, 1, 1]} : vector<4x1x8xf32> to vector<1x1x8xf32>
    %179 = vector.shape_cast %178 : vector<1x1x8xf32> to vector<1x8xf32>
    %180 = vector.broadcast %179 : vector<1x8xf32> to vector<16x8xf32>
    %181 = arith.addf %177, %180 : vector<16x8xf32>
    %182 = vector.shape_cast %181 : vector<16x8xf32> to vector<2x8x8xf32>
    %183 = vector.extract_strided_slice %15 {offsets = [3, 0, 0], sizes = [1, 32, 8], strides = [1, 1, 1]} : vector<4x32x8xbf16> to vector<1x32x8xbf16>
    %184 = vector.shape_cast %183 : vector<1x32x8xbf16> to vector<32x8xbf16>
    %cst_61 = arith.constant dense<0.000000e+00> : vector<16x8xf32>
    %185 = tpu.matmul %8, %184, %cst_61 {dimension_numbers = #tpu.dot_dimension_numbers<[1], [0], [0], [1], [0, 0, 1, 1], [], []>} : vector<16x32xbf16>, vector<32x8xbf16>, vector<16x8xf32> -> vector<16x8xf32>
    %186 = vector.extract_strided_slice %21 {offsets = [3, 0, 0], sizes = [1, 1, 8], strides = [1, 1, 1]} : vector<4x1x8xf32> to vector<1x1x8xf32>
    %187 = vector.shape_cast %186 : vector<1x1x8xf32> to vector<1x8xf32>
    %188 = vector.broadcast %187 : vector<1x8xf32> to vector<16x8xf32>
    %189 = arith.addf %185, %188 : vector<16x8xf32>
    %190 = vector.shape_cast %189 : vector<16x8xf32> to vector<2x8x8xf32>
    %191 = arith.truncf %174 : vector<2x8x8xf32> to vector<2x8x8xbf16>
    %192 = arith.truncf %182 : vector<2x8x8xf32> to vector<2x8x8xbf16>
    "tpu.trace_start"() <{level = 10 : i32, message = "bld,bmd->blm"}> : () -> ()
    %cst_62 = arith.constant dense<0.000000e+00> : vector<2x8x8xf32>
    %193 = tpu.matmul %191, %192, %cst_62 {dimension_numbers = #tpu.dot_dimension_numbers<[2], [2], [1], [1], [0, 0, 0, 1, 1, 1], [0], [0]>} : vector<2x8x8xbf16>, vector<2x8x8xbf16>, vector<2x8x8xf32> -> vector<2x8x8xf32>
    "tpu.trace_stop"() : () -> ()
    %cst_63 = arith.constant dense<0xFF800000> : vector<2x8xf32>
    %194 = vector.multi_reduction <maximumf>, %193, %cst_63 [2] : vector<2x8x8xf32> to vector<2x8xf32>
    %195 = vector.shape_cast %194 : vector<2x8xf32> to vector<2x8x1xf32>
    %196 = vector.broadcast %195 : vector<2x8x1xf32> to vector<2x8x8xf32>
    %197 = arith.subf %193, %196 : vector<2x8x8xf32>
    %198 = math.exp %197 : vector<2x8x8xf32>
    %cst_64 = arith.constant dense<0.000000e+00> : vector<2x8xf32>
    %199 = vector.multi_reduction <add>, %198, %cst_64 [2] : vector<2x8x8xf32> to vector<2x8xf32>
    %200 = vector.shape_cast %199 : vector<2x8xf32> to vector<2x8x1xf32>
    %201 = tpu.reciprocal %200 : vector<2x8x1xf32> -> vector<2x8x1xf32>
    %202 = vector.broadcast %201 : vector<2x8x1xf32> to vector<2x8x8xf32>
    %203 = arith.mulf %198, %202 : vector<2x8x8xf32>
    %204 = arith.addf %157, %203 : vector<2x8x8xf32>
    %205 = arith.truncf %203 : vector<2x8x8xf32> to vector<2x8x8xbf16>
    %206 = arith.truncf %190 : vector<2x8x8xf32> to vector<2x8x8xbf16>
    "tpu.trace_start"() <{level = 10 : i32, message = "blm,bmd->bld"}> : () -> ()
    %cst_65 = arith.constant dense<0.000000e+00> : vector<2x8x8xf32>
    %207 = tpu.matmul %205, %206, %cst_65 {dimension_numbers = #tpu.dot_dimension_numbers<[2], [1], [1], [2], [0, 0, 0, 1, 1, 2], [0], [0]>} : vector<2x8x8xbf16>, vector<2x8x8xbf16>, vector<2x8x8xf32> -> vector<2x8x8xf32>
    "tpu.trace_stop"() : () -> ()
    %208 = vector.shape_cast %207 : vector<2x8x8xf32> to vector<16x8xf32>
    %209 = arith.truncf %208 : vector<16x8xf32> to vector<16x8xbf16>
    %210 = vector.extract_strided_slice %23 {offsets = [3, 0, 0], sizes = [1, 8, 32], strides = [1, 1, 1]} : vector<4x8x32xbf16> to vector<1x8x32xbf16>
    %211 = vector.shape_cast %210 : vector<1x8x32xbf16> to vector<8x32xbf16>
    %cst_66 = arith.constant dense<0.000000e+00> : vector<16x32xf32>
    %212 = tpu.matmul %209, %211, %cst_66 {dimension_numbers = #tpu.dot_dimension_numbers<[1], [0], [0], [1], [0, 0, 1, 1], [], []>} : vector<16x8xbf16>, vector<8x32xbf16>, vector<16x32xf32> -> vector<16x32xf32>
    %213 = arith.addf %166, %212 : vector<16x32xf32>
    %c0_67 = arith.constant 0 : index
    %c0_68 = arith.constant 0 : index
    %c0_69 = arith.constant 0 : index
    %214 = vector.load %arg11[%c0_67, %c0_68, %c0_69] : memref<1x1x32xf32, #tpu.memory_space<vmem>>, vector<1x1x32xf32>
    %215 = vector.shape_cast %214 : vector<1x1x32xf32> to vector<1x32xf32>
    %216 = vector.broadcast %215 : vector<1x32xf32> to vector<16x32xf32>
    %217 = arith.addf %213, %216 : vector<16x32xf32>
    %218 = arith.addf %5, %217 : vector<16x32xf32>
    %cst_70 = arith.constant dense<0.000000e+00> : vector<16xf32>
    %219 = vector.multi_reduction <add>, %218, %cst_70 [1] : vector<16x32xf32> to vector<16xf32>
    %220 = vector.shape_cast %219 : vector<16xf32> to vector<16x1xf32>
    %cst_71 = arith.constant 3.200000e+01 : f32
    %221 = vector.broadcast %cst_71 : f32 to vector<16x1xf32>
    %222 = arith.divf %220, %221 : vector<16x1xf32>
    %223 = vector.broadcast %222 : vector<16x1xf32> to vector<16x32xf32>
    %224 = arith.subf %218, %223 : vector<16x32xf32>
    %225 = arith.mulf %224, %224 : vector<16x32xf32>
    %cst_72 = arith.constant dense<0.000000e+00> : vector<16xf32>
    %226 = vector.multi_reduction <add>, %225, %cst_72 [1] : vector<16x32xf32> to vector<16xf32>
    %227 = vector.shape_cast %226 : vector<16xf32> to vector<16x1xf32>
    %cst_73 = arith.constant 3.200000e+01 : f32
    %228 = vector.broadcast %cst_73 : f32 to vector<16x1xf32>
    %229 = arith.divf %227, %228 : vector<16x1xf32>
    %230 = vector.broadcast %222 : vector<16x1xf32> to vector<16x32xf32>
    %231 = arith.subf %218, %230 : vector<16x32xf32>
    %cst_74 = arith.constant 9.99999974E-6 : f32
    %232 = vector.broadcast %cst_74 : f32 to vector<16x1xf32>
    %233 = arith.addf %229, %232 : vector<16x1xf32>
    %234 = math.rsqrt %233 : vector<16x1xf32>
    %235 = vector.broadcast %234 : vector<16x1xf32> to vector<16x32xf32>
    %236 = arith.mulf %231, %235 : vector<16x32xf32>
    %c0_75 = arith.constant 0 : index
    %c0_76 = arith.constant 0 : index
    %c0_77 = arith.constant 0 : index
    %237 = vector.load %arg12[%c0_75, %c0_76, %c0_77] : memref<1x1x32xf32, #tpu.memory_space<vmem>>, vector<1x1x32xf32>
    %238 = vector.shape_cast %237 : vector<1x1x32xf32> to vector<1x32xf32>
    %239 = vector.broadcast %238 : vector<1x32xf32> to vector<16x32xf32>
    %240 = arith.mulf %236, %239 : vector<16x32xf32>
    %c0_78 = arith.constant 0 : index
    %c0_79 = arith.constant 0 : index
    %c0_80 = arith.constant 0 : index
    %241 = vector.load %arg13[%c0_78, %c0_79, %c0_80] : memref<1x1x32xf32, #tpu.memory_space<vmem>>, vector<1x1x32xf32>
    %242 = vector.shape_cast %241 : vector<1x1x32xf32> to vector<1x32xf32>
    %243 = vector.broadcast %242 : vector<1x32xf32> to vector<16x32xf32>
    %244 = arith.addf %240, %243 : vector<16x32xf32>
    %245 = vector.shape_cast %244 : vector<16x32xf32> to vector<2x8x32xf32>
    %c0_81 = arith.constant 0 : index
    %c0_82 = arith.constant 0 : index
    %c0_83 = arith.constant 0 : index
    %246 = vector.load %arg17[%c0_81, %c0_82, %c0_83] : memref<2x8x8xf32, #tpu.memory_space<vmem>>, vector<2x8x8xf32>
    %247 = arith.addf %246, %204 : vector<2x8x8xf32>
    %c0_84 = arith.constant 0 : index
    %c0_85 = arith.constant 0 : index
    %c0_86 = arith.constant 0 : index
    %248 = vector.load %arg16[%c0_84, %c0_85, %c0_86] : memref<2x8x32xf32, #tpu.memory_space<vmem>>, vector<2x8x32xf32>
    tpu.vector_store %arg16[%c0_84, %c0_85, %c0_86], %245 {strides = array<i32>} : memref<2x8x32xf32, #tpu.memory_space<vmem>>, vector<2x8x32xf32>,
    %c0_87 = arith.constant 0 : index
    %c0_88 = arith.constant 0 : index
    %c0_89 = arith.constant 0 : index
    %249 = vector.load %arg17[%c0_87, %c0_88, %c0_89] : memref<2x8x8xf32, #tpu.memory_space<vmem>>, vector<2x8x8xf32>
    tpu.vector_store %arg17[%c0_87, %c0_88, %c0_89], %247 {strides = array<i32>} : memref<2x8x8xf32, #tpu.memory_space<vmem>>, vector<2x8x8xf32>,
    %c1_i32 = arith.constant 1 : i32
    %250 = arith.cmpi eq, %arg1, %c1_i32 : i32
    %251 = arith.extui %250 : i1 to i32
    %c0_i32_90 = arith.constant 0 : i32
    %252 = arith.cmpi ne, %251, %c0_i32_90 : i32
    scf.if %252 {
      %c0_91 = arith.constant 0 : index
      %c0_92 = arith.constant 0 : index
      %c0_93 = arith.constant 0 : index
      %253 = vector.load %arg14[%c0_91, %c0_92, %c0_93] : memref<2x8x32xf32, #tpu.memory_space<vmem>>, vector<2x8x32xf32>
      tpu.vector_store %arg14[%c0_91, %c0_92, %c0_93], %245 {strides = array<i32>} : memref<2x8x32xf32, #tpu.memory_space<vmem>>, vector<2x8x32xf32>,
      %cst_94 = arith.constant 1.250000e-01 : f32
      %254 = vector.broadcast %cst_94 : f32 to vector<2x8x8xf32>
      %255 = arith.mulf %247, %254 : vector<2x8x8xf32>
      %c0_95 = arith.constant 0 : index
      %c0_96 = arith.constant 0 : index
      %c0_97 = arith.constant 0 : index
      %256 = vector.load %arg15[%c0_95, %c0_96, %c0_97] : memref<2x8x8xf32, #tpu.memory_space<vmem>>, vector<2x8x8xf32>
      tpu.vector_store %arg15[%c0_95, %c0_96, %c0_97], %255 {strides = array<i32>} : memref<2x8x8xf32, #tpu.memory_space<vmem>>, vector<2x8x8xf32>,
    } else {
    }
    return
  }
  func.func @transform_0(%arg0: i32, %arg1: i32) -> (i32, i32, i32) {
    %c0_i32 = arith.constant 0 : i32
    %c0_i32_0 = arith.constant 0 : i32
    %c0_i32_1 = arith.constant 0 : i32
    return %arg0, %c0_i32, %c0_i32_0 : i32, i32, i32
  }
  func.func @transform_1(%arg0: i32, %arg1: i32) -> (i32, i32, i32) {
    %c0_i32 = arith.constant 0 : i32
    %c0_i32_0 = arith.constant 0 : i32
    %c0_i32_1 = arith.constant 0 : i32
    return %arg0, %c0_i32, %c0_i32_0 : i32, i32, i32
  }
  func.func @transform_2(%arg0: i32, %arg1: i32) -> (i32, i32, i32, i32) {
    %c0_i32 = arith.constant 0 : i32
    %c0_i32_0 = arith.constant 0 : i32
    %c0_i32_1 = arith.constant 0 : i32
    %c0_i32_2 = arith.constant 0 : i32
    return %arg1, %c0_i32, %c0_i32_0, %c0_i32_1 : i32, i32, i32, i32
  }
  func.func @transform_3(%arg0: i32, %arg1: i32) -> (i32, i32, i32, i32) {
    %c0_i32 = arith.constant 0 : i32
    %c0_i32_0 = arith.constant 0 : i32
    %c0_i32_1 = arith.constant 0 : i32
    %c0_i32_2 = arith.constant 0 : i32
    return %arg1, %c0_i32, %c0_i32_0, %c0_i32_1 : i32, i32, i32, i32
  }
  func.func @transform_4(%arg0: i32, %arg1: i32) -> (i32, i32, i32, i32) {
    %c0_i32 = arith.constant 0 : i32
    %c0_i32_0 = arith.constant 0 : i32
    %c0_i32_1 = arith.constant 0 : i32
    %c0_i32_2 = arith.constant 0 : i32
    return %arg1, %c0_i32, %c0_i32_0, %c0_i32_1 : i32, i32, i32, i32
  }
  func.func @transform_5(%arg0: i32, %arg1: i32) -> (i32, i32, i32, i32) {
    %c0_i32 = arith.constant 0 : i32
    %c0_i32_0 = arith.constant 0 : i32
    %c0_i32_1 = arith.constant 0 : i32
    %c0_i32_2 = arith.constant 0 : i32
    return %arg1, %c0_i32, %c0_i32_0, %c0_i32_1 : i32, i32, i32, i32
  }
  func.func @transform_6(%arg0: i32, %arg1: i32) -> (i32, i32, i32, i32) {
    %c0_i32 = arith.constant 0 : i32
    %c0_i32_0 = arith.constant 0 : i32
    %c0_i32_1 = arith.constant 0 : i32
    %c0_i32_2 = arith.constant 0 : i32
    return %arg1, %c0_i32, %c0_i32_0, %c0_i32_1 : i32, i32, i32, i32
  }
  func.func @transform_7(%arg0: i32, %arg1: i32) -> (i32, i32, i32, i32) {
    %c0_i32 = arith.constant 0 : i32
    %c0_i32_0 = arith.constant 0 : i32
    %c0_i32_1 = arith.constant 0 : i32
    %c0_i32_2 = arith.constant 0 : i32
    return %arg1, %c0_i32, %c0_i32_0, %c0_i32_1 : i32, i32, i32, i32
  }
  func.func @transform_8(%arg0: i32, %arg1: i32) -> (i32, i32, i32, i32) {
    %c0_i32 = arith.constant 0 : i32
    %c0_i32_0 = arith.constant 0 : i32
    %c0_i32_1 = arith.constant 0 : i32
    %c0_i32_2 = arith.constant 0 : i32
    return %arg1, %c0_i32, %c0_i32_0, %c0_i32_1 : i32, i32, i32, i32
  }
  func.func @transform_9(%arg0: i32, %arg1: i32) -> (i32, i32, i32) {
    %c0_i32 = arith.constant 0 : i32
    %c0_i32_0 = arith.constant 0 : i32
    %c0_i32_1 = arith.constant 0 : i32
    return %arg1, %c0_i32, %c0_i32_0 : i32, i32, i32
  }
  func.func @transform_10(%arg0: i32, %arg1: i32) -> (i32, i32, i32) {
    %c0_i32 = arith.constant 0 : i32
    %c0_i32_0 = arith.constant 0 : i32
    %c0_i32_1 = arith.constant 0 : i32
    return %arg1, %c0_i32, %c0_i32_0 : i32, i32, i32
  }
  func.func @transform_11(%arg0: i32, %arg1: i32) -> (i32, i32, i32) {
    %c0_i32 = arith.constant 0 : i32
    %c0_i32_0 = arith.constant 0 : i32
    %c0_i32_1 = arith.constant 0 : i32
    return %arg1, %c0_i32, %c0_i32_0 : i32, i32, i32
  }
  func.func @transform_12(%arg0: i32, %arg1: i32) -> (i32, i32, i32) {
    %c0_i32 = arith.constant 0 : i32
    %c0_i32_0 = arith.constant 0 : i32
    %c0_i32_1 = arith.constant 0 : i32
    return %arg0, %c0_i32, %c0_i32_0 : i32, i32, i32
  }
  func.func @transform_13(%arg0: i32, %arg1: i32) -> (i32, i32, i32) {
    %c0_i32 = arith.constant 0 : i32
    %c0_i32_0 = arith.constant 0 : i32
    %c0_i32_1 = arith.constant 0 : i32
    return %arg0, %c0_i32, %c0_i32_0 : i32, i32, i32
  }
}

</mosaic_0001>

<bundles_post_ra>
// kernel: tpu_custom_call.1
= control target key start
LH: loop header
LB: loop body
LE: loop exit
PB: predicated region body
PF: predicated region fallthrough
CT: control target
= control target key end

     0   :  { %s2805_s0 = inlined_call_operand.vmem [shape: f32[2,8,32], index: 0, kind: input, shape index: {}]   ;;  %s2806_s1 = inlined_call_operand.vmem [shape: f32[2,8,32], index: 1, kind: input, shape index: {}]   ;;  %s2807_s2 = inlined_call_operand.vmem [shape: bf16[2,4,32,8], index: 2, kind: input, shape index: {}]   ;;  %s2808_s3 = inlined_call_operand.vmem [shape: bf16[2,4,32,8], index: 3, kind: input, shape index: {}]   ;;  %s2809_s4 = inlined_call_operand.vmem [shape: bf16[2,4,32,8], index: 4, kind: input, shape index: {}]   ;;  %s2810_s5 = inlined_call_operand.vmem [shape: f32[2,4,1,8], index: 5, kind: input, shape index: {}]   ;;  %s2811_s6 = inlined_call_operand.vmem [shape: f32[2,4,1,8], index: 6, kind: input, shape index: {}]   ;;  %s2812_s7 = inlined_call_operand.vmem [shape: f32[2,4,1,8], index: 7, kind: input, shape index: {}]   ;;  %s2813_s8 = inlined_call_operand.vmem [shape: bf16[2,4,8,32], index: 8, kind: input, shape index: {}]   ;;  %s2814_s9 = inlined_call_operand.vmem [shape: f32[2,1,32], index: 9, kind: input, shape index: {}]   ;;  %s2815_s10 = inlined_call_operand.vmem [shape: f32[2,1,32], index: 10, kind: input, shape index: {}]   ;;  %s2816_s11 = inlined_call_operand.vmem [shape: f32[2,1,32], index: 11, kind: input, shape index: {}]   ;;  %s2817_s12 = inlined_call_operand.hbm [shape: f32[2,8,32], index: 12, kind: output, shape index: {0}]   ;;  %s2818_s13 = inlined_call_operand.hbm [shape: f32[2,8,8], index: 13, kind: output, shape index: {1}]  }
   0x1   :  { %2820 = sst [smem:[#allocation12_spill]] %s2807_s2 }
   0x2   :  { %2821 = sst [smem:[#allocation13_spill]] %s2808_s3 }
   0x3   :  { %2822 = sst [smem:[#allocation14_spill]] %s2809_s4 }
   0x4   :  { %2823 = sst [smem:[#allocation15_spill]] %s2810_s5 }
   0x5   :  { %2824 = sst [smem:[#allocation16_spill]] %s2811_s6 }
   0x6   :  { %2825 = sst [smem:[#allocation17_spill]] %s2817_s12 }
   0x7   :  { %2826 = sst [smem:[#allocation18_spill]] %s2818_s13 }
   0x8   :  { %19 = vsyncpa [#allocation5], 0 }
   0x9   :  { %20 = vsyncpa [#allocation7], 0  ;;  %s2467_s25 = smov 0   ;;  %s2469_s26 = smov 0  }
   0xa   :  { %s2471_s27 = smov 0  }
   0xb LB: > { %2827 = sst [smem:[#allocation10_spill]] %s2385_s26  ;;  %s35_s29 = sadd.s32 1, %s2385_s26  ;;  %s2389_s27 = sphi %s2471_s27, %s26_s27   ;;  %s2385_s26 = sphi %s2469_s26, %s2839_s26   ;;  %s2381_s25 = sphi %s2467_s25, %s2838_s25  }
   0xc   : > { %p36_p0 = scmp.ge.s32.totalorder %s35_s29, 2  ;;  %p2031_p1 = scmp.ge.s32.totalorder %s2389_s27, 1 }
   0xd   : > { %p507_p2 = scmp.lt.s32.totalorder %s2389_s27, 3 }
   0xe   : > { %s2841_s29 = smov (%p36_p0, %s35_s29), 0 }
   0xf   : > { %2828 = sst [smem:[#allocation11_spill]] %s2841_s29  ;;  %p508_p3 = pnand %p2031_p1, %p507_p2 }
  0x10   : > { %p604_p4 = scmp.lt.s32.totalorder (!%p508_p3), %s2381_s25, 1  ;;  %s2829_s2 = sld [smem:[#allocation12_spill]] (!%p508_p3) }
  0x11   : > { %511 = sbr.rel (%p508_p3) target bundleno = 2668 (0xa6c), region = 68  ;;  %s2830_s3 = sld [smem:[#allocation13_spill]] (!%p508_p3) }
  0x12   : > { %s2831_s4 = sld [smem:[#allocation14_spill]] (!%p508_p3)  ;;  %p2043_p5 = scmp.ne.s32.totalorder (!%p508_p3), %s2381_s25, 0 }
  0x13   : > { %s2832_s5 = sld [smem:[#allocation15_spill]] (!%p508_p3) }
  0x14   : > { %s2833_s6 = sld [smem:[#allocation16_spill]] (!%p508_p3) }
  0x16   : > { %s2490_s30 = scalar_select %p604_p4, %s2381_s25, 1 }
  0x18   : > { %s2179_s14 = sshll.u32 %s2490_s30, 6  ;;  %s2038_s15 = sshll.u32 %s2490_s30, 2 }
  0x19   : > { %s2497_s18 = scalar_lea.vmem %s2829_s2, %s2179_s14  ;;  %s2502_s21 = scalar_lea.vmem %s2830_s3, %s2179_s14 }
  0x1a   : > { %s2507_s24 = scalar_lea.vmem %s2831_s4, %s2179_s14  ;;  %s2512_s26 = scalar_lea.vmem %s2832_s5, %s2038_s15 }
  0x1b   : > { %s2517_s16 = scalar_lea.vmem %s2833_s6, %s2038_s15  ;;  %s2522_s19 = scalar_lea.vmem %s2812_s7, %s2038_s15 }
  0x1c   : > { %s2182_s20 = sshll.u32 %s2490_s30, 4  ;;  %s638_s14 = scalar_lea.vmem %s2814_s9, %s2490_s30 }
  0x1d   : > { %s2532_s28 = scalar_lea.vmem %s2813_s8, %s2182_s20  ;;  %s641_s12 = scalar_lea.vmem %s2815_s10, %s2490_s30 }
  0x1e   : > { %s644_s2 = scalar_lea.vmem %s2816_s11, %s2490_s30  ;;  %651 = sbr.rel (%p2043_p5) target bundleno = 40 (0x28), region = 72 }
  0x23   : > { %v652_v0 = vld [vmem:[%s2805_s0] sm:$0xff]  ;;  %vm654_vm0 = vcmask 261120   ;;  %v653_v1 = vld [vmem:[%s2805_s0 + $0x8] sm:$0xff]  ;;  %vm657_vm1 = vcmask 64512   ;;  %v2391_v2 = vmov 0.0  }
  0x24   : > { %655 = vst.msk [vmem:[#allocation2] sm:$0xff] %vm654_vm0, %v652_v0 }
  0x25   : > { %656 = vst.msk [vmem:[#allocation2 + $0x8] sm:$0xff] %vm654_vm0, %v653_v1 }
  0x26   : > { %658 = vst.msk [vmem:[#allocation3] sm:$0xff] %vm657_vm1, %v2391_v2 }
  0x27   : > { %659 = vst.msk [vmem:[#allocation3 + $0x8] sm:$0xff] %vm657_vm1, %v2391_v2 }
  0x28 PF: > { %v2184_v3 = vld [vmem:[%s2497_s18 + $0x8] sm:$0xff]  ;;  %v2183_v5 = vld [vmem:[%s2497_s18] sm:$0xff]  ;;  %vm747_vm2 = vcmask 261120   ;;  %vm830_vm3 = vcmask 64512   ;;  %v2186_v20 = vld [vmem:[%s2497_s18 + $0x18] sm:$0xff]  ;;  %vm926_vm4 = vcmask 1043456  }
  0x29   : > { %v2192_v4 = vld [vmem:[%s2502_s21 + $0x8] sm:$0xff]  ;;  %v2191_v6 = vld [vmem:[%s2502_s21] sm:$0xff]  ;;  %757 = vmatpush.bf16.msra.mxu0 %v2184_v3  ;;  %v2185_v23 = vld [vmem:[%s2497_s18 + $0x10] sm:$0xff]  ;;  %p2172_p6 = scmp.ne.s32.totalorder %s2381_s25, 1 }
  0x2a   : > { %786 = vmatpush.bf16.msra.mxu1 %v2192_v4  ;;  %v662_v9 = vld [vmem:[%s2806_s1] sm:$0xff]  ;;  %v663_v10 = vld [vmem:[%s2806_s1 + $0x8] sm:$0xff]  ;;  %v2194_v28 = vld [vmem:[%s2502_s21 + $0x18] sm:$0xff] }
  0x2b   : > { %v2553_v7 = vld [vmem:[#allocation2] sm:$0xff]  ;;  %v2193_v32 = vld [vmem:[%s2502_s21 + $0x10] sm:$0xff]  ;;  %v2200_v38 = vld [vmem:[%s2507_s24 + $0x8] sm:$0xff] }
  0x2c   : > { %v661_v8 = vld [vmem:[#allocation2 + $0x8] sm:$0xff]  ;;  %v664_v11 = vadd.f32 %v662_v9, %v2553_v7  ;;  %v2250_v14 = vld [vmem:[%s2517_s16] ss:$0 sm:$0xff]  ;;  %818 = vmatpush.bf16.msra.mxu2 %v2200_v38  ;;  %v2252_v43 = vld [vmem:[%s2512_s26 + $0x1] ss:$0 sm:$0xff] }
  0x2d   : > { %v665_v12 = vadd.f32 %v663_v10, %v661_v8  ;;  %758 = vmatpush.bf16.msra.mxu0 %v2183_v5  ;;  %v2249_v16 = vld [vmem:[%s2512_s26] ss:$0 sm:$0xff]  ;;  %v2587_v42 = vpack.c.bf16 %v661_v8, %v2553_v7  ;;  %v2251_v45 = vld [vmem:[%s2517_s16 + $0x1] ss:$0 sm:$0xff] }
  0x2e   : > { %787 = vmatpush.bf16.msra.mxu1 %v2191_v6  ;;  %v2199_v40 = vld [vmem:[%s2507_s24] sm:$0xff] }
  0x2f   : > { %v2562_v13 = vpack.c.bf16 %v665_v12, %v664_v11  ;;  %v2253_v6 = vld [vmem:[%s2522_s19] ss:$0 sm:$0xff] }
  0x30   : > { %819 = vmatpush.bf16.msra.mxu2 %v2199_v40 }
  0x31   : > { %2052 = vmatmul.msk.bf16.vlgmr.msra.gmra.mxu0 %vm747_vm2, %v2562_v13  ;;  %2061 = vmatmul.msk.bf16.vlgmr.msra.gmra.mxu1 %vm747_vm2, %v2562_v13 }
  0x33   : > { %2070 = vmatmul.msk.bf16.vlgmr.msra.gmra.mxu2 %vm747_vm2, %v2587_v42 }
  0xae   : > { %v789_v15 = vpop.f32.mrf.mxu1  ;;  %v760_v18 = vpop.f32.mrf.mxu0 }
  0xaf   : > { %v790_v17 = vadd.f32 %v2250_v14, %v789_v15  ;;  %v761_v21 = vadd.f32 %v2249_v16, %v760_v18 }
  0xb1   : > { %v828_v19 = vpack.c.bf16 %v790_v17, %v790_v17  ;;  %v826_v25 = vpack.c.bf16 %v761_v21, %v761_v21 }
  0xb3   : > { %v835_v22 = vsel %vm830_vm3, %v828_v19, 0 }
  0xb4   : > { %844 = vmatpush.bf16.xpose.msra.mxu3 %v835_v22 }
  0xb6   : > { %v791_v24 = vpop.f32.mrf.mxu1  ;;  %v762_v29 = vpop.f32.mrf.mxu0 }
  0xb7   : > { %v792_v26 = vadd.f32 %v2250_v14, %v791_v24  ;;  %v763_v31 = vadd.f32 %v2249_v16, %v762_v29  ;;  %v821_v5 = vpop.f32.mrf.mxu2 }
  0xb8   : > { %v822_v8 = vadd.f32 %v2253_v6, %v821_v5 }
  0xb9   : > { %v829_v27 = vpack.c.bf16 %v792_v26, %v792_v26  ;;  %v827_v33 = vpack.c.bf16 %v763_v31, %v763_v31 }
  0xba   : > { %v921_v11 = vpack.c.bf16 %v822_v8, %v822_v8 }
  0xbb   : > { %2071 = vmatmul.msk.bf16.vlgmr.msra.gmra.mxu3 %vm830_vm3, %v826_v25  ;;  %v854_v30 = vsel %vm830_vm3, %v829_v27, 0  ;;  %v2202_v25 = vld [vmem:[%s2507_s24 + $0x18] sm:$0xff] }
  0xbc   : > { %984 = vmatpush.bf16.msrb.mxu3 %v2186_v20  ;;  %863 = vmatpush.bf16.xpose.msrb.mxu0 %v854_v30  ;;  %v928_v16 = vsel %vm926_vm4, %v921_v11, 0 }
  0xbd   : > { %937 = vmatpush.bf16.msrb.mxu1 %v928_v16 }
  0xbf   : > { %v823_v10 = vpop.f32.mrf.mxu2 }
  0xc0   : > { %985 = vmatpush.bf16.msrb.mxu3 %v2185_v23  ;;  %v824_v12 = vadd.f32 %v2253_v6, %v823_v10 }
  0xc1   : > { %1042 = vmatpush.bf16.msra.mxu1 %v2202_v25 }
  0xc2   : > { %v922_v14 = vpack.c.bf16 %v824_v12, %v824_v12 }
  0xc3   : > { %2072 = vmatmul.msk.bf16.vlgmr.msrb.gmra.mxu0 %vm830_vm3, %v827_v33 }
  0xc4   : > { %1013 = vmatpush.bf16.msra.mxu0 %v2194_v28  ;;  %v947_v17 = vsel %vm926_vm4, %v922_v14, 0 }
  0xc5   : > { %956 = vmatpush.bf16.msrb.mxu2 %v947_v17 }
  0xc8   : > { %1014 = vmatpush.bf16.msra.mxu0 %v2193_v32 }
  0xcb   : > { %2083 = vmatmul.msk.bf16.vlgmr.msrb.gmra.mxu3 %vm747_vm2, %v2562_v13 }
  0xd3   : > { %2092 = vmatmul.msk.bf16.vlgmr.msra.gmra.mxu0 %vm747_vm2, %v2562_v13 }
 0x13e   : > { %v846_v34 = vpop.f32.mrf.mxu3 }
 0x13f   : > { %v869_v35 = vsel %vm830_vm3, %v846_v34, -inf }
 0x140   : > { %v865_v36 = vpop.f32.mrf.mxu0  ;;  %870 = vmax.xlane.f32.xlu1 %v869_v35 }
 0x141   : > { %v872_v37 = vsel %vm830_vm3, %v865_v36, -inf }
 0x142   : > { %873 = vmax.xlane.f32.xlu0 %v872_v37 }
 0x146   : > { %v848_v39 = vpop.f32.mrf.mxu3 }
 0x148   : > { %v867_v41 = vpop.f32.mrf.mxu0 }
 0x14e   : > { %v987_v44 = vpop.f32.mrf.mxu3 }
 0x14f   : > { %v2593_v46 = vadd.f32 %v2252_v43, %v987_v44 }
 0x150   : > { %v1016_v47 = vpop.f32.mrf.mxu0 }
 0x151   : > { %v1017_v48 = vadd.f32 %v2251_v45, %v1016_v47 }
 0x153   : > { %v1052_v9 = vpack.c.bf16 %v1017_v48, %v1017_v48  ;;  %v1050_v48 = vpack.c.bf16 %v2593_v46, %v2593_v46 }
 0x155   : > { %v1058_v15 = vsel %vm830_vm3, %v1052_v9, 0 }
 0x156   : > { %v989_v51 = vpop.f32.mrf.mxu3  ;;  %1067 = vmatpush.bf16.xpose.msra.mxu2 %v1058_v15 }
 0x157   : > { %v990_v54 = vadd.f32 %v2252_v43, %v989_v51 }
 0x158   : > { %v1018_v49 = vpop.f32.mrf.mxu0 }
 0x159   : > { %v1019_v50 = vadd.f32 %v2251_v45, %v1018_v49  ;;  %v1051_v55 = vpack.c.bf16 %v990_v54, %v990_v54  ;;  %v728_v54 = vld [vmem:[%s2532_s28] sm:$0xf] }
 0x15b   : > { %v1053_v52 = vpack.c.bf16 %v1019_v50, %v1019_v50 }
 0x15d   : > { %v1077_v53 = vsel %vm830_vm3, %v1053_v52, 0 }
 0x15e   : > { %1086 = vmatpush.bf16.xpose.msra.mxu3 %v1077_v53 }
 0x165   : > { %2103 = vmatmul.msk.bf16.vlgmr.msra.gmra.mxu3 %vm830_vm3, %v1051_v55  ;;  %v1209_v55 = vsel %vm926_vm4, %v728_v54, 0 }
 0x166   : > { %1218 = vmatpush.bf16.msrb.mxu3 %v1209_v55 }
 0x1b3   : > { %v871_v56 = vpop.xlane.xlu1 %870 }
 0x1b4   : > { %v875_v57 = vsub.f32 %v846_v34, %v871_v56  ;;  %v2201_v34 = vld [vmem:[%s2507_s24 + $0x10] sm:$0xff] }
 0x1b5   : > { %v874_v58 = vpop.xlane.xlu0 %873  ;;  %1043 = vmatpush.bf16.msra.mxu1 %v2201_v34 }
 0x1b6   : > { %v877_v59 = vmul.f32 1.442695, %v875_v57  ;;  %v876_v60 = vsub.f32 %v865_v36, %v874_v58 }
 0x1b8   : > { %2264 = vpow2.f32 %v877_v59  ;;  %v879_v61 = vmul.f32 1.442695, %v876_v60  ;;  %v2254_v59 = vld [vmem:[%s2522_s19 + $0x1] ss:$0 sm:$0xff] }
 0x1ba   : > { %2266 = vpow2.f32 %v879_v61 }
 0x1be   : > { %v2265_v62 = vpop.eup %2264 }
 0x1bf   : > { %v881_v63 = vsel %vm830_vm3, %v2265_v62, 0.0 }
 0x1c0   : > { %v2267_v0 = vpop.eup %2266  ;;  %882 = vadd.xlane.f32.xlu1 %v881_v63 }
 0x1c1   : > { %v884_v1 = vsel %vm830_vm3, %v2267_v0, 0.0 }
 0x1c2   : > { %885 = vadd.xlane.f32.xlu0 %v884_v1 }
 0x1e8   : > { %v2599_v2 = vpop.f32.mrf.mxu3 }
 0x1e9   : > { %v1095_v3 = vsel %vm830_vm3, %v2599_v2, -inf }
 0x1ea   : > { %1096 = vmax.xlane.f32.xlu2 %v1095_v3 }
 0x1f0   : > { %v1090_v4 = vpop.f32.mrf.mxu3 }
 0x233   : > { %v883_v18 = vpop.xlane.xlu1 %882 }
 0x234   : > { %2268 = vrcp.f32 %v883_v18  ;;  %v898_v26 = vand.u32 2147483648, %v883_v18  ;;  %v896_v28 = vand.u32 2147483647, %v883_v18  ;;  %vm892_vm6 = vweird.f32 %v883_v18 }
 0x235   : > { %v886_v19 = vpop.xlane.xlu0 %885 }
 0x236   : > { %2270 = vrcp.f32 %v886_v19  ;;  %v912_v30 = vand.u32 2147483648, %v886_v19  ;;  %v910_v33 = vand.u32 2147483647, %v886_v19  ;;  %v899_v35 = vor.u32 1.1754944e-38, %v898_v26 }
 0x237   : > { %vm897_vm9 = vcmp.eq.f32.partialorder %v896_v28, 8.507059e+37  ;;  %vm906_vm10 = vweird.f32 %v886_v19 }
 0x238   : > { %v913_v38 = vor.u32 1.1754944e-38, %v912_v30  ;;  %vm911_vm12 = vcmp.eq.f32.partialorder %v910_v33, 8.507059e+37  ;;  %v2196_v30 = vld [vmem:[%s2502_s21 + $0x28] sm:$0xff]  ;;  %v2187_v33 = vld [vmem:[%s2497_s18 + $0x20] sm:$0xff] }
 0x23a   : > { %v2269_v20 = vpop.eup %2268 }
 0x23b   : > { %v888_v21 = vmul.f32 %v2269_v20, %v883_v18  ;;  %vm893_vm5 = vweird.f32 %v2269_v20 }
 0x23c   : > { %v2271_v22 = vpop.eup %2270  ;;  %vm894_vm8 = vmor %vm892_vm6, %vm893_vm5 }
 0x23d   : > { %v889_v23 = vsub.f32 1.0, %v888_v21  ;;  %v902_v24 = vmul.f32 %v2271_v22, %v886_v19  ;;  %vm907_vm7 = vweird.f32 %v2271_v22 }
 0x23e   : > { %vm908_vm11 = vmor %vm906_vm10, %vm907_vm7 }
 0x23f   : > { %v890_v27 = vmul.f32 %v2269_v20, %v889_v23  ;;  %v903_v29 = vsub.f32 1.0, %v902_v24 }
 0x241   : > { %v891_v31 = vadd.f32 %v2269_v20, %v890_v27  ;;  %v904_v32 = vmul.f32 %v2271_v22, %v903_v29 }
 0x243   : > { %v895_v36 = vsel %vm894_vm8, %v2269_v20, %v891_v31  ;;  %v905_v37 = vadd.f32 %v2271_v22, %v904_v32  ;;  %v2195_v31 = vld [vmem:[%s2502_s21 + $0x20] sm:$0xff]  ;;  %v2188_v32 = vld [vmem:[%s2497_s18 + $0x28] sm:$0xff] }
 0x244   : > { %v900_v39 = vsel %vm897_vm9, %v899_v35, %v895_v36 }
 0x245   : > { %v909_v40 = vsel %vm908_vm11, %v2271_v22, %v905_v37  ;;  %v2609_v41 = vmul.f32 %v2265_v62, %v900_v39 }
 0x246   : > { %v914_v43 = vsel %vm911_vm12, %v913_v38, %v909_v40 }
 0x247   : > { %v919_v44 = vpack.c.bf16 %v2609_v41, %v2609_v41  ;;  %v2613_v45 = vmul.f32 %v2267_v0, %v914_v43 }
 0x249   : > { %2073 = vmatmul.msk.bf16.vlgmr.msrb.gmra.mxu1 %vm830_vm3, %v919_v44  ;;  %v920_v47 = vpack.c.bf16 %v2613_v45, %v2613_v45 }
 0x24b   : > { %2074 = vmatmul.msk.bf16.vlgmr.msrb.gmra.mxu2 %vm830_vm3, %v920_v47 }
 0x259   : > { %2101 = vmatmul.msk.bf16.vlgmr.msra.gmra.mxu1 %vm747_vm2, %v2587_v42 }
 0x25b   : > { %2102 = vmatmul.msk.bf16.vlgmr.msra.gmra.mxu2 %vm830_vm3, %v1050_v48 }
 0x25d   : > { %v1097_v49 = vpop.xlane.xlu2 %1096 }
 0x25e   : > { %v1099_v50 = vsub.f32 %v2599_v2, %v1097_v49 }
 0x260   : > { %v1102_v51 = vmul.f32 1.442695, %v1099_v50 }
 0x262   : > { %2272 = vpow2.f32 %v1102_v51  ;;  %v729_v51 = vld [vmem:[%s2532_s28 + $0x4] sm:$0xf] }
 0x268   : > { %v2273_v52 = vpop.eup %2272 }
 0x269   : > { %v1107_v53 = vsel %vm830_vm3, %v2273_v52, 0.0 }
 0x26a   : > { %1108 = vadd.xlane.f32.xlu0 %v1107_v53  ;;  %v2255_v53 = vld [vmem:[%s2517_s16 + $0x2] ss:$0 sm:$0xff] }
 0x2c6   : > { %v939_v46 = vpop.f32.mrf.mxu1 }
 0x2ce   : > { %v941_v56 = vpop.f32.mrf.mxu1  ;;  %v958_v57 = vpop.f32.mrf.mxu2 }
 0x2cf   : > { %v962_v58 = vpack.c.bf16 %v958_v57, %v939_v46 }
 0x2d1   : > { %2107 = vmatmul.msk.bf16.vlgmr.msrb.gmra.mxu3 %vm830_vm3, %v962_v58 }
 0x2d6   : > { %v960_v60 = vpop.f32.mrf.mxu2  ;;  %v1045_v61 = vpop.f32.mrf.mxu1 }
 0x2d7   : > { %v1046_v62 = vadd.f32 %v2254_v59, %v1045_v61 }
 0x2d9   : > { %v1144_v63 = vpack.c.bf16 %v1046_v62, %v1046_v62 }
 0x2db   : > { %v1150_v0 = vsel %vm926_vm4, %v1144_v63, 0 }
 0x2dc   : > { %1159 = vmatpush.bf16.msrb.mxu0 %v1150_v0  ;;  %v2256_v0 = vld [vmem:[%s2512_s26 + $0x2] ss:$0 sm:$0xff] }
 0x2dd   : > { %v1109_v1 = vpop.xlane.xlu0 %1108 }
 0x2de   : > { %2274 = vrcp.f32 %v1109_v1  ;;  %v1069_v2 = vpop.f32.mrf.mxu2  ;;  %v1047_v3 = vpop.f32.mrf.mxu1  ;;  %v1135_v11 = vand.u32 2147483648, %v1109_v1  ;;  %vm1129_vm13 = vweird.f32 %v1109_v1  ;;  %v1133_v15 = vand.u32 2147483647, %v1109_v1 }
 0x2df   : > { %v1092_v4 = vsel %vm830_vm3, %v1069_v2, -inf  ;;  %v1048_v5 = vadd.f32 %v2254_v59, %v1047_v3 }
 0x2e0   : > { %1093 = vmax.xlane.f32.xlu2 %v1092_v4  ;;  %v1136_v17 = vor.u32 1.1754944e-38, %v1135_v11  ;;  %vm1134_vm0 = vcmp.eq.f32.partialorder %v1133_v15, 8.507059e+37  ;;  %1246 = vmatpush.bf16.msra.mxu0 %v2188_v32 }
 0x2e1   : > { %v1145_v6 = vpack.c.bf16 %v1048_v5, %v1048_v5 }
 0x2e3   : > { %v1169_v8 = vsel %vm926_vm4, %v1145_v6, 0 }
 0x2e4   : > { %v2275_v9 = vpop.eup %2274  ;;  %1178 = vmatpush.bf16.msrb.mxu1 %v1169_v8  ;;  %1247 = vmatpush.bf16.msra.mxu0 %v2187_v33  ;;  %v2204_v8 = vld [vmem:[%s2507_s24 + $0x28] sm:$0xff]  ;;  %v2257_v33 = vld [vmem:[%s2522_s19 + $0x2] ss:$0 sm:$0xff] }
 0x2e5   : > { %v1125_v10 = vmul.f32 %v2275_v9, %v1109_v1  ;;  %vm1130_vm14 = vweird.f32 %v2275_v9 }
 0x2e6   : > { %v1071_v12 = vpop.f32.mrf.mxu2  ;;  %vm1131_vm15 = vmor %vm1129_vm13, %vm1130_vm14 }
 0x2e7   : > { %v1126_v14 = vsub.f32 1.0, %v1125_v10 }
 0x2e8   : > { %1275 = vmatpush.bf16.msra.mxu1 %v2196_v30 }
 0x2e9   : > { %v1127_v16 = vmul.f32 %v2275_v9, %v1126_v14 }
 0x2eb   : > { %v1128_v18 = vadd.f32 %v2275_v9, %v1127_v16 }
 0x2ec   : > { %1276 = vmatpush.bf16.msra.mxu1 %v2195_v31 }
 0x2ed   : > { %v1132_v19 = vsel %vm1131_vm15, %v2275_v9, %v1128_v18  ;;  %v2203_v9 = vld [vmem:[%s2507_s24 + $0x20] sm:$0xff] }
 0x2ee   : > { %v1137_v20 = vsel %vm1134_vm0, %v1136_v17, %v1132_v19 }
 0x2ef   : > { %v2633_v21 = vmul.f32 %v2273_v52, %v1137_v20  ;;  %v1189_v52 = vsel %vm926_vm4, %v729_v51, 0  ;;  %v2189_v51 = vld [vmem:[%s2497_s18 + $0x30] sm:$0xff] }
 0x2f0   : > { %1198 = vmatpush.bf16.msrb.mxu2 %v1189_v52 }
 0x2f1   : > { %v1143_v22 = vpack.c.bf16 %v2633_v21, %v2633_v21 }
 0x2f3   : > { %2105 = vmatmul.msk.bf16.vlgmr.msrb.gmra.mxu1 %vm830_vm3, %v1143_v22 }
 0x2f4   : > { %1304 = vmatpush.bf16.msra.mxu2 %v2204_v8 }
 0x2f8   : > { %1305 = vmatpush.bf16.msra.mxu2 %v2203_v9 }
 0x303   : > { %2125 = vmatmul.msk.bf16.vlgmr.msra.gmra.mxu1 %vm747_vm2, %v2562_v13 }
 0x353   : > { %v1094_v23 = vpop.xlane.xlu2 %1093 }
 0x354   : > { %v1098_v24 = vsub.f32 %v1069_v2, %v1094_v23  ;;  %v2663_v10 = vpop.f32.mrf.mxu3 }
 0x356   : > { %v1100_v25 = vmul.f32 1.442695, %v1098_v24 }
 0x358   : > { %2276 = vpow2.f32 %v1100_v25 }
 0x35c   : > { %v2667_v11 = vpop.f32.mrf.mxu3 }
 0x35e   : > { %v2277_v26 = vpop.eup %2276 }
 0x35f   : > { %v1104_v27 = vsel %vm830_vm3, %v2277_v26, 0.0 }
 0x360   : > { %1105 = vadd.xlane.f32.xlu1 %v1104_v27 }
 0x370   : > { %v1180_v28 = vpop.f32.mrf.mxu1 }
 0x378   : > { %v1182_v29 = vpop.f32.mrf.mxu1 }
 0x380   : > { %v1278_v54 = vpop.f32.mrf.mxu1 }
 0x381   : > { %v1279_v55 = vadd.f32 %v2255_v53, %v1278_v54 }
 0x383   : > { %v1314_v46 = vpack.c.bf16 %v1279_v55, %v1279_v55 }
 0x385   : > { %v1320_v56 = vsel %vm830_vm3, %v1314_v46, 0 }
 0x386   : > { %1329 = vmatpush.bf16.xpose.msra.mxu3 %v1320_v56 }
 0x388   : > { %v1280_v57 = vpop.f32.mrf.mxu1 }
 0x389   : > { %v1281_v58 = vadd.f32 %v2255_v53, %v1280_v57 }
 0x38b   : > { %v1315_v59 = vpack.c.bf16 %v1281_v58, %v1281_v58 }
 0x38d   : > { %v1339_v60 = vsel %vm830_vm3, %v1315_v59, 0 }
 0x3d3   : > { %v1106_v34 = vpop.xlane.xlu1 %1105 }
 0x3d4   : > { %2278 = vrcp.f32 %v1106_v34  ;;  %v1121_v38 = vand.u32 2147483648, %v1106_v34  ;;  %v1119_v40 = vand.u32 2147483647, %v1106_v34  ;;  %vm1115_vm5 = vweird.f32 %v1106_v34 }
 0x3d6   : > { %v1122_v44 = vor.u32 1.1754944e-38, %v1121_v38  ;;  %vm1120_vm7 = vcmp.eq.f32.partialorder %v1119_v40, 8.507059e+37 }
 0x3da   : > { %v2279_v35 = vpop.eup %2278 }
 0x3db   : > { %v1111_v36 = vmul.f32 %v2279_v35, %v1106_v34  ;;  %vm1116_vm1 = vweird.f32 %v2279_v35 }
 0x3dc   : > { %vm1117_vm6 = vmor %vm1115_vm5, %vm1116_vm1 }
 0x3dd   : > { %v1112_v37 = vsub.f32 1.0, %v1111_v36 }
 0x3df   : > { %v1113_v39 = vmul.f32 %v2279_v35, %v1112_v37 }
 0x3e1   : > { %v1114_v43 = vadd.f32 %v2279_v35, %v1113_v39 }
 0x3e3   : > { %v1118_v47 = vsel %vm1117_vm6, %v2279_v35, %v1114_v43  ;;  %v2198_v43 = vld [vmem:[%s2502_s21 + $0x38] sm:$0xff] }
 0x3e4   : > { %v1123_v48 = vsel %vm1120_vm7, %v1122_v44, %v1118_v47  ;;  %v2197_v44 = vld [vmem:[%s2502_s21 + $0x30] sm:$0xff]  ;;  %v2190_v47 = vld [vmem:[%s2497_s18 + $0x38] sm:$0xff] }
 0x3e5   : > { %v2645_v49 = vmul.f32 %v2277_v26, %v1123_v48 }
 0x3e7   : > { %v1142_v50 = vpack.c.bf16 %v2645_v49, %v2645_v49 }
 0x3e9   : > { %2104 = vmatmul.msk.bf16.vlgmr.msrb.gmra.mxu0 %vm830_vm3, %v1142_v50 }
 0x3ea   : > { %1348 = vmatpush.bf16.xpose.msrb.mxu0 %v1339_v60 }
 0x3f9   : > { %2116 = vmatmul.msk.bf16.vlgmr.msra.gmra.mxu0 %vm747_vm2, %v2562_v13 }
 0x3fa   : > { %1490 = vmatpush.bf16.msra.mxu0 %v2190_v47 }
 0x3fe   : > { %1491 = vmatpush.bf16.msra.mxu0 %v2189_v51 }
 0x466   : > { %v1161_v61 = vpop.f32.mrf.mxu0 }
 0x467   : > { %v1184_v62 = vpack.c.bf16 %v1180_v28, %v1161_v61 }
 0x469   : > { %2106 = vmatmul.msk.bf16.vlgmr.msrb.gmra.mxu2 %vm830_vm3, %v1184_v62 }
 0x46e   : > { %v1163_v63 = vpop.f32.mrf.mxu0 }
 0x476   : > { %v1249_v1 = vpop.f32.mrf.mxu0 }
 0x477   : > { %v1250_v2 = vadd.f32 %v2256_v0, %v1249_v1 }
 0x479   : > { %v1312_v3 = vpack.c.bf16 %v1250_v2, %v1250_v2  ;;  %2134 = vmatmul.msk.bf16.vlgmr.msra.gmra.mxu2 %vm747_vm2, %v2587_v42 }
 0x47b   : > { %2135 = vmatmul.msk.bf16.vlgmr.msra.gmra.mxu3 %vm830_vm3, %v1312_v3 }
 0x47e   : > { %v1251_v4 = vpop.f32.mrf.mxu0 }
 0x47f   : > { %v1252_v5 = vadd.f32 %v2256_v0, %v1251_v4 }
 0x481   : > { %v1313_v6 = vpack.c.bf16 %v1252_v5, %v1252_v5  ;;  %v1140_v5 = vadd.f32 %v2645_v49, %v2609_v41  ;;  %v730_v41 = vld [vmem:[%s2532_s28 + $0x8] sm:$0xf] }
 0x482   : > { %v1451_v49 = vsel %vm926_vm4, %v730_v41, 0 }
 0x483   : > { %2136 = vmatmul.msk.bf16.vlgmr.msrb.gmra.mxu0 %vm830_vm3, %v1313_v6  ;;  %1460 = vmatpush.bf16.msrb.mxu3 %v1451_v49 }
 0x493   : > { %2148 = vmatmul.msk.bf16.vlgmr.msra.gmra.mxu0 %vm747_vm2, %v2562_v13 }
 0x4ec   : > { %v2673_v30 = vpop.f32.mrf.mxu2 }
 0x4f4   : > { %v2675_v31 = vpop.f32.mrf.mxu2 }
 0x4fc   : > { %v1307_v32 = vpop.f32.mrf.mxu2 }
 0x4fd   : > { %v1308_v35 = vadd.f32 %v2257_v33, %v1307_v32 }
 0x4fe   : > { %v1331_v12 = vpop.f32.mrf.mxu3 }
 0x4ff   : > { %v1354_v14 = vsel %vm830_vm3, %v1331_v12, -inf  ;;  %v1406_v37 = vpack.c.bf16 %v1308_v35, %v1308_v35 }
 0x500   : > { %v1350_v15 = vpop.f32.mrf.mxu0  ;;  %1355 = vmax.xlane.f32.xlu2 %v1354_v14 }
 0x501   : > { %v1357_v16 = vsel %vm830_vm3, %v1350_v15, -inf  ;;  %v1412_v39 = vsel %vm926_vm4, %v1406_v37, 0 }
 0x502   : > { %1358 = vmax.xlane.f32.xlu0 %v1357_v16  ;;  %1421 = vmatpush.bf16.msrb.mxu1 %v1412_v39 }
 0x504   : > { %v1309_v34 = vpop.f32.mrf.mxu2 }
 0x505   : > { %v1310_v36 = vadd.f32 %v2257_v33, %v1309_v34 }
 0x506   : > { %v1333_v17 = vpop.f32.mrf.mxu3  ;;  %1519 = vmatpush.bf16.msra.mxu1 %v2198_v43  ;;  %v2205_v43 = vld [vmem:[%s2507_s24 + $0x30] sm:$0xff] }
 0x507   : > { %v1407_v38 = vpack.c.bf16 %v1310_v36, %v1310_v36 }
 0x508   : > { %v1352_v18 = vpop.f32.mrf.mxu0 }
 0x509   : > { %v1431_v40 = vsel %vm926_vm4, %v1407_v38, 0 }
 0x50a   : > { %1440 = vmatpush.bf16.msrb.mxu2 %v1431_v40  ;;  %1520 = vmatpush.bf16.msra.mxu1 %v2197_v44  ;;  %v2206_v40 = vld [vmem:[%s2507_s24 + $0x38] sm:$0xff]  ;;  %v1221_v44 = vadd.f32 %v2663_v10, %v2673_v30 }
 0x50e   : > { %1548 = vmatpush.bf16.msra.mxu2 %v2206_v40 }
 0x512   : > { %1549 = vmatpush.bf16.msra.mxu2 %v2205_v43 }
 0x573   : > { %v1356_v19 = vpop.xlane.xlu2 %1355 }
 0x574   : > { %v1360_v20 = vsub.f32 %v1331_v12, %v1356_v19  ;;  %v1141_v12 = vadd.f32 %v2633_v21, %v2613_v45 }
 0x575   : > { %v1359_v22 = vpop.xlane.xlu0 %1358 }
 0x576   : > { %v1362_v23 = vmul.f32 1.442695, %v1360_v20  ;;  %v1361_v24 = vsub.f32 %v1350_v15, %v1359_v22  ;;  %v2258_v22 = vld [vmem:[%s2517_s16 + $0x3] ss:$0 sm:$0xff] }
 0x578   : > { %2280 = vpow2.f32 %v1362_v23  ;;  %v1364_v25 = vmul.f32 1.442695, %v1361_v24 }
 0x57a   : > { %2282 = vpow2.f32 %v1364_v25 }
 0x57e   : > { %v2281_v26 = vpop.eup %2280 }
 0x57f   : > { %v1366_v27 = vsel %vm830_vm3, %v2281_v26, 0.0 }
 0x580   : > { %v2283_v28 = vpop.eup %2282  ;;  %1367 = vadd.xlane.f32.xlu1 %v1366_v27  ;;  %v1493_v27 = vpop.f32.mrf.mxu0 }
 0x581   : > { %v1369_v29 = vsel %vm830_vm3, %v2283_v28, 0.0 }
 0x582   : > { %1370 = vadd.xlane.f32.xlu2 %v1369_v29 }
 0x588   : > { %v1495_v36 = vpop.f32.mrf.mxu0 }
 0x5f3   : > { %v1368_v48 = vpop.xlane.xlu1 %1367 }
 0x5f4   : > { %2284 = vrcp.f32 %v1368_v48  ;;  %v1383_v56 = vand.u32 2147483648, %v1368_v48  ;;  %v1381_v58 = vand.u32 2147483647, %v1368_v48  ;;  %vm1377_vm9 = vweird.f32 %v1368_v48 }
 0x5f5   : > { %v1371_v50 = vpop.xlane.xlu2 %1370 }
 0x5f6   : > { %2286 = vrcp.f32 %v1371_v50  ;;  %v1397_v60 = vand.u32 2147483648, %v1371_v50  ;;  %v1395_v63 = vand.u32 2147483647, %v1371_v50  ;;  %v1384_v0 = vor.u32 1.1754944e-38, %v1383_v56  ;;  %v2260_v56 = vld [vmem:[%s2522_s19 + $0x3] ss:$0 sm:$0xff] }
 0x5f7   : > { %vm1382_vm12 = vcmp.eq.f32.partialorder %v1381_v58, 8.507059e+37  ;;  %vm1391_vm13 = vweird.f32 %v1371_v50 }
 0x5f8   : > { %v1398_v4 = vor.u32 1.1754944e-38, %v1397_v60  ;;  %vm1396_vm15 = vcmp.eq.f32.partialorder %v1395_v63, 8.507059e+37 }
 0x5fa   : > { %v2285_v52 = vpop.eup %2284 }
 0x5fb   : > { %v1373_v53 = vmul.f32 %v2285_v52, %v1368_v48  ;;  %vm1378_vm8 = vweird.f32 %v2285_v52 }
 0x5fc   : > { %v2287_v54 = vpop.eup %2286  ;;  %vm1379_vm11 = vmor %vm1377_vm9, %vm1378_vm8 }
 0x5fd   : > { %v1374_v55 = vsub.f32 1.0, %v1373_v53  ;;  %v1387_v46 = vmul.f32 %v2287_v54, %v1371_v50  ;;  %vm1392_vm10 = vweird.f32 %v2287_v54  ;;  %v1223_v50 = vadd.f32 %v2667_v11, %v2675_v31 }
 0x5fe   : > { %vm1393_vm14 = vmor %vm1391_vm13, %vm1392_vm10 }
 0x5ff   : > { %v1375_v57 = vmul.f32 %v2285_v52, %v1374_v55  ;;  %v1388_v59 = vsub.f32 1.0, %v1387_v46 }
 0x601   : > { %v1376_v61 = vadd.f32 %v2285_v52, %v1375_v57  ;;  %v1389_v62 = vmul.f32 %v2287_v54, %v1388_v59 }
 0x603   : > { %v1380_v1 = vsel %vm1379_vm11, %v2285_v52, %v1376_v61  ;;  %v1390_v2 = vadd.f32 %v2287_v54, %v1389_v62 }
 0x604   : > { %v1385_v3 = vsel %vm1382_vm12, %v1384_v0, %v1380_v1 }
 0x605   : > { %v1400_v6 = vmul.f32 %v2281_v26, %v1385_v3  ;;  %v1394_v8 = vsel %vm1393_vm14, %v2287_v54, %v1390_v2  ;;  %v2259_v26 = vld [vmem:[%s2512_s26 + $0x3] ss:$0 sm:$0xff] }
 0x606   : > { %v1399_v9 = vsel %vm1396_vm15, %v1398_v4, %v1394_v8  ;;  %v1494_v29 = vadd.f32 %v2259_v26, %v1493_v27  ;;  %v1496_v38 = vadd.f32 %v2259_v26, %v1495_v36 }
 0x607   : > { %v2690_v14 = vadd.f32 %v1400_v6, %v1140_v5  ;;  %v1401_v15 = vmul.f32 %v2283_v28, %v1399_v9  ;;  %v1404_v16 = vpack.c.bf16 %v1400_v6, %v1400_v6 }
 0x608   : > { %v1556_v33 = vpack.c.bf16 %v1494_v29, %v1494_v29  ;;  %v1557_v39 = vpack.c.bf16 %v1496_v38, %v1496_v38 }
 0x609   : > { %v2692_v17 = vadd.f32 %v1401_v15, %v1141_v12  ;;  %2137 = vmatmul.msk.bf16.vlgmr.msrb.gmra.mxu1 %vm830_vm3, %v1404_v16  ;;  %v1405_v18 = vpack.c.bf16 %v1401_v15, %v1401_v15 }
 0x60b   : > { %2138 = vmatmul.msk.bf16.vlgmr.msrb.gmra.mxu2 %vm830_vm3, %v1405_v18 }
 0x619   : > { %2157 = vmatmul.msk.bf16.vlgmr.msra.gmra.mxu1 %vm747_vm2, %v2562_v13 }
 0x61b   : > { %2166 = vmatmul.msk.bf16.vlgmr.msra.gmra.mxu2 %vm747_vm2, %v2587_v42 }
 0x686   : > { %v1423_v45 = vpop.f32.mrf.mxu1 }
 0x68e   : > { %v1425_v21 = vpop.f32.mrf.mxu1  ;;  %v1442_v19 = vpop.f32.mrf.mxu2 }
 0x68f   : > { %v1446_v20 = vpack.c.bf16 %v1442_v19, %v1423_v45 }
 0x691   : > { %2139 = vmatmul.msk.bf16.vlgmr.msrb.gmra.mxu3 %vm830_vm3, %v1446_v20 }
 0x696   : > { %v1444_v23 = vpop.f32.mrf.mxu2  ;;  %v1522_v24 = vpop.f32.mrf.mxu1 }
 0x697   : > { %v1523_v25 = vadd.f32 %v2258_v22, %v1522_v24 }
 0x699   : > { %v1558_v28 = vpack.c.bf16 %v1523_v25, %v1523_v25 }
 0x69b   : > { %v1564_v13 = vsel %vm830_vm3, %v1558_v28, 0 }
 0x69c   : > { %1573 = vmatpush.bf16.xpose.msra.mxu3 %v1564_v13 }
 0x69e   : > { %v1524_v32 = vpop.f32.mrf.mxu1  ;;  %v1551_v42 = vpop.f32.mrf.mxu2 }
 0x69f   : > { %v1525_v34 = vadd.f32 %v2258_v22, %v1524_v32  ;;  %v1552_v60 = vadd.f32 %v2260_v56, %v1551_v42 }
 0x6a1   : > { %v1559_v35 = vpack.c.bf16 %v1525_v34, %v1525_v34  ;;  %v1650_v61 = vpack.c.bf16 %v1552_v60, %v1552_v60  ;;  %v1784_v34 = vld [vmem:[#allocation3] sm:$0xff] }
 0x6a3   : > { %v1583_v37 = vsel %vm830_vm3, %v1559_v35, 0  ;;  %2167 = vmatmul.msk.bf16.vlgmr.msra.gmra.mxu3 %vm830_vm3, %v1556_v33  ;;  %v1656_v63 = vsel %vm926_vm4, %v1650_v61, 0 }
 0x6a4   : > { %1592 = vmatpush.bf16.xpose.msrb.mxu0 %v1583_v37  ;;  %1665 = vmatpush.bf16.msrb.mxu1 %v1656_v63 }
 0x6a6   : > { %v1553_v4 = vpop.f32.mrf.mxu2 }
 0x6a7   : > { %v1554_v5 = vadd.f32 %v2260_v56, %v1553_v4 }
 0x6a9   : > { %v1651_v6 = vpack.c.bf16 %v1554_v5, %v1554_v5 }
 0x6ab   : > { %2168 = vmatmul.msk.bf16.vlgmr.msrb.gmra.mxu0 %vm830_vm3, %v1557_v39  ;;  %v1675_v8 = vsel %vm926_vm4, %v1651_v6, 0  ;;  %v1785_v39 = vld [vmem:[#allocation3 + $0x8] sm:$0xff] }
 0x6ac   : > { %1684 = vmatpush.bf16.msrb.mxu2 %v1675_v8 }
 0x714   : > { %v1462_v47 = vpop.f32.mrf.mxu3 }
 0x715   : > { %v2711_v48 = vadd.f32 %v1462_v47, %v1221_v44 }
 0x71c   : > { %v1464_v51 = vpop.f32.mrf.mxu3 }
 0x71d   : > { %v2717_v52 = vadd.f32 %v1464_v51, %v1223_v50 }
 0x726   : > { %v1575_v53 = vpop.f32.mrf.mxu3 }
 0x727   : > { %v1598_v54 = vsel %vm830_vm3, %v1575_v53, -inf }
 0x728   : > { %v1594_v55 = vpop.f32.mrf.mxu0  ;;  %1599 = vmax.xlane.f32.xlu1 %v1598_v54 }
 0x729   : > { %v1601_v10 = vsel %vm830_vm3, %v1594_v55, -inf }
 0x72a   : > { %1602 = vmax.xlane.f32.xlu0 %v1601_v10  ;;  %v2261_v10 = vld [vmem:[%s638_s14] ss:$0 sm:$0xff] }
 0x72e   : > { %v1577_v30 = vpop.f32.mrf.mxu3 }
 0x730   : > { %v1596_v46 = vpop.f32.mrf.mxu0 }
 0x79b   : > { %v1600_v57 = vpop.xlane.xlu1 %1599 }
 0x79c   : > { %v1604_v58 = vsub.f32 %v1575_v53, %v1600_v57 }
 0x79d   : > { %v1603_v59 = vpop.xlane.xlu0 %1602 }
 0x79e   : > { %v1606_v11 = vmul.f32 1.442695, %v1604_v58  ;;  %v1605_v31 = vsub.f32 %v1594_v55, %v1603_v59 }
 0x7a0   : > { %2288 = vpow2.f32 %v1606_v11  ;;  %v1608_v62 = vmul.f32 1.442695, %v1605_v31  ;;  %v2302_v11 = vld [vmem:[#allocation2 + $0x8] sm:$0xff] }
 0x7a2   : > { %2290 = vpow2.f32 %v1608_v62  ;;  %v2392_v62 = vmov 32.0  }
 0x7a6   : > { %v2289_v0 = vpop.eup %2288 }
 0x7a7   : > { %v1610_v1 = vsel %vm830_vm3, %v2289_v0, 0.0 }
 0x7a8   : > { %v2291_v2 = vpop.eup %2290  ;;  %1611 = vadd.xlane.f32.xlu0 %v1610_v1 }
 0x7a9   : > { %v1613_v3 = vsel %vm830_vm3, %v2291_v2, 0.0 }
 0x7aa   : > { %1614 = vadd.xlane.f32.xlu2 %v1613_v3 }
 0x81b   : > { %v1612_v9 = vpop.xlane.xlu0 %1611 }
 0x81c   : > { %2292 = vrcp.f32 %v1612_v9  ;;  %v1627_v45 = vand.u32 2147483648, %v1612_v9  ;;  %v1625_v19 = vand.u32 2147483647, %v1612_v9  ;;  %vm1621_vm1 = vweird.f32 %v1612_v9 }
 0x81d   : > { %v1615_v12 = vpop.xlane.xlu2 %1614 }
 0x81e   : > { %2294 = vrcp.f32 %v1615_v12  ;;  %v1641_v22 = vand.u32 2147483648, %v1615_v12  ;;  %v1639_v25 = vand.u32 2147483647, %v1615_v12  ;;  %v1628_v26 = vor.u32 1.1754944e-38, %v1627_v45 }
 0x81f   : > { %vm1626_vm7 = vcmp.eq.f32.partialorder %v1625_v19, 8.507059e+37  ;;  %vm1635_vm8 = vweird.f32 %v1615_v12  ;;  %2296 = vrcp.f32 %v2392_v62 }
 0x820   : > { %v1642_v29 = vor.u32 1.1754944e-38, %v1641_v22  ;;  %vm1640_vm10 = vcmp.eq.f32.partialorder %v1639_v25, 8.507059e+37 }
 0x822   : > { %v2293_v15 = vpop.eup %2292 }
 0x823   : > { %v1617_v16 = vmul.f32 %v2293_v15, %v1612_v9  ;;  %vm1622_vm0 = vweird.f32 %v2293_v15 }
 0x824   : > { %v2295_v18 = vpop.eup %2294  ;;  %vm1623_vm6 = vmor %vm1621_vm1, %vm1622_vm0 }
 0x825   : > { %v1618_v41 = vsub.f32 1.0, %v1617_v16  ;;  %v1631_v49 = vmul.f32 %v2295_v18, %v1615_v12  ;;  %vm1636_vm5 = vweird.f32 %v2295_v18  ;;  %v2297_v63 = vpop.eup %2296 }
 0x826   : > { %vm1637_vm9 = vmor %vm1635_vm8, %vm1636_vm5 }
 0x827   : > { %v1619_v21 = vmul.f32 %v2293_v15, %v1618_v41  ;;  %v1632_v20 = vsub.f32 1.0, %v1631_v49 }
 0x829   : > { %v1620_v23 = vadd.f32 %v2293_v15, %v1619_v21  ;;  %v1633_v24 = vmul.f32 %v2295_v18, %v1632_v20 }
 0x82b   : > { %v1624_v27 = vsel %vm1623_vm6, %v2293_v15, %v1620_v23  ;;  %v1634_v28 = vadd.f32 %v2295_v18, %v1633_v24 }
 0x82c   : > { %v1629_v13 = vsel %vm1626_vm7, %v1628_v26, %v1624_v27 }
 0x82d   : > { %v1644_v32 = vmul.f32 %v2289_v0, %v1629_v13  ;;  %v1638_v33 = vsel %vm1637_vm9, %v2295_v18, %v1634_v28  ;;  %v1728_v0 = vmul.f32 32.0, %v2297_v63  ;;  %v2262_v13 = vld [vmem:[%s641_s12] ss:$0 sm:$0xff] }
 0x82e   : > { %v1643_v35 = vsel %vm1640_vm10, %v1642_v29, %v1638_v33  ;;  %v2263_v33 = vld [vmem:[%s644_s2] ss:$0 sm:$0xff] }
 0x82f   : > { %v1646_v36 = vadd.f32 %v1644_v32, %v2690_v14  ;;  %v1645_v37 = vmul.f32 %v2291_v2, %v1643_v35  ;;  %v1648_v38 = vpack.c.bf16 %v1644_v32, %v1644_v32  ;;  %v731_v14 = vld [vmem:[%s2532_s28 + $0xc] sm:$0xf] }
 0x830   : > { %v1695_v50 = vsel %vm926_vm4, %v731_v14, 0  ;;  %vm1732_vm4 = vweird.f32 %v2297_v63 }
 0x831   : > { %v2727_v40 = vadd.f32 %v1784_v34, %v1646_v36  ;;  %v1647_v43 = vadd.f32 %v1645_v37, %v2692_v17  ;;  %2169 = vmatmul.msk.bf16.vlgmr.msrb.gmra.mxu1 %vm830_vm3, %v1648_v38  ;;  %v1649_v44 = vpack.c.bf16 %v1645_v37, %v1645_v37  ;;  %1704 = vmatpush.bf16.msrb.mxu3 %v1695_v50 }
 0x833   : > { %1790 = vst.msk [vmem:[#allocation3] sm:$0xff] %vm830_vm3, %v2727_v40  ;;  %v2733_v47 = vadd.f32 %v1785_v39, %v1647_v43  ;;  %2170 = vmatmul.msk.bf16.vlgmr.msrb.gmra.mxu2 %vm830_vm3, %v1649_v44 }
 0x835   : > { %1791 = vst.msk [vmem:[#allocation3 + $0x8] sm:$0xff] %vm830_vm3, %v2733_v47 }
 0x8ae   : > { %v1667_v51 = vpop.f32.mrf.mxu1 }
 0x8b6   : > { %v1669_v17 = vpop.f32.mrf.mxu1  ;;  %v1686_v53 = vpop.f32.mrf.mxu2 }
 0x8b7   : > { %v1690_v54 = vpack.c.bf16 %v1686_v53, %v1667_v51 }
 0x8b9   : > { %2171 = vmatmul.msk.bf16.vlgmr.msrb.gmra.mxu3 %vm830_vm3, %v1690_v54 }
 0x8be   : > { %v1688_v55 = vpop.f32.mrf.mxu2 }
 0x93c   : > { %v1706_v30 = vpop.f32.mrf.mxu3 }
 0x93d   : > { %v1711_v46 = vadd.f32 %v1706_v30, %v2711_v48  ;;  %v1729_v48 = vsub.f32 1.0, %v1728_v0 }
 0x93f   : > { %v1717_v56 = vadd.f32 %v2261_v10, %v1711_v46  ;;  %v1730_v1 = vmul.f32 %v2297_v63, %v1729_v48 }
 0x941   : > { %v1719_v57 = vadd.f32 %v1717_v56, %v2553_v7  ;;  %v1731_v2 = vadd.f32 %v2297_v63, %v1730_v1 }
 0x943   : > { %v1721_v58 = vsel %vm747_vm2, %v1719_v57, 0.0  ;;  %v1733_v7 = vsel %vm1732_vm4, %v2297_v63, %v1731_v2 }
 0x944   : > { %1722 = vadd.xlane.f32.xlu1 %v1721_v58  ;;  %v1708_v42 = vpop.f32.mrf.mxu3 }
 0x945   : > { %v1712_v59 = vadd.f32 %v1708_v42, %v2717_v52 }
 0x947   : > { %v1718_v60 = vadd.f32 %v2261_v10, %v1712_v59 }
 0x949   : > { %v1720_v31 = vadd.f32 %v2302_v11, %v1718_v60 }
 0x94b   : > { %v1724_v61 = vsel %vm747_vm2, %v1720_v31, 0.0 }
 0x94c   : > { %1725 = vadd.xlane.f32.xlu2 %v1724_v61 }
 0x9b7   : > { %v1723_v3 = vpop.xlane.xlu1 %1722 }
 0x9b8   : > { %v1734_v4 = vmul.f32 %v1733_v7, %v1723_v3 }
 0x9ba   : > { %v1736_v5 = vsub.f32 %v1719_v57, %v1734_v4 }
 0x9bc   : > { %v1738_v6 = vmul.f32 %v1736_v5, %v1736_v5 }
 0x9be   : > { %v1740_v52 = vsel %vm747_vm2, %v1738_v6, 0.0 }
 0x9bf   : > { %1741 = vadd.xlane.f32.xlu0 %v1740_v52  ;;  %v1726_v8 = vpop.xlane.xlu2 %1725 }
 0x9c0   : > { %v1735_v9 = vmul.f32 %v1733_v7, %v1726_v8 }
 0x9c2   : > { %v1737_v12 = vsub.f32 %v1720_v31, %v1735_v9 }
 0x9c4   : > { %v1739_v15 = vmul.f32 %v1737_v12, %v1737_v12 }
 0x9c6   : > { %v1743_v16 = vsel %vm747_vm2, %v1739_v15, 0.0 }
 0x9c7   : > { %1744 = vadd.xlane.f32.xlu1 %v1743_v16 }
 0xa32   : > { %v1742_v18 = vpop.xlane.xlu0 %1741 }
 0xa33   : > { %v1746_v41 = vmul.f32 %v1742_v18, %v1733_v7 }
 0xa35   : > { %v1748_v49 = vadd.f32 1e-05, %v1746_v41 }
 0xa37   : > { %2298 = vrsqrt.f32 %v1748_v49  ;;  %vm1756_vm12 = vweird.f32 %v1748_v49 }
 0xa3a   : > { %v1745_v45 = vpop.xlane.xlu1 %1744 }
 0xa3b   : > { %v1747_v21 = vmul.f32 %v1745_v45, %v1733_v7 }
 0xa3d   : > { %v2299_v19 = vpop.eup %2298  ;;  %v1749_v20 = vadd.f32 1e-05, %v1747_v21 }
 0xa3e   : > { %v1751_v22 = vmul.f32 %v2299_v19, %v1748_v49  ;;  %vm1757_vm11 = vweird.f32 %v2299_v19 }
 0xa3f   : > { %2300 = vrsqrt.f32 %v1749_v20  ;;  %vm1758_vm13 = vmor %vm1756_vm12, %vm1757_vm11  ;;  %vm1766_vm15 = vweird.f32 %v1749_v20 }
 0xa40   : > { %v1752_v23 = vmul.f32 %v2299_v19, %v1751_v22 }
 0xa42   : > { %v1753_v24 = vmul.f32 0.5, %v1752_v23 }
 0xa44   : > { %v1754_v25 = vsub.f32 1.5, %v1753_v24 }
 0xa45   : > { %v2301_v26 = vpop.eup %2300 }
 0xa46   : > { %v1755_v27 = vmul.f32 %v2299_v19, %v1754_v25  ;;  %v1761_v28 = vmul.f32 %v2301_v26, %v1749_v20  ;;  %vm1767_vm14 = vweird.f32 %v2301_v26 }
 0xa47   : > { %vm1768_vm0 = vmor %vm1766_vm15, %vm1767_vm14 }
 0xa48   : > { %v1759_v29 = vsel %vm1758_vm13, %v2299_v19, %v1755_v27  ;;  %v1762_v32 = vmul.f32 %v2301_v26, %v1761_v28 }
 0xa49   : > { %v1770_v34 = vmul.f32 %v1759_v29, %v1736_v5 }
 0xa4a   : > { %v1763_v35 = vmul.f32 0.5, %v1762_v32 }
 0xa4b   : > { %v1776_v36 = vmul.f32 %v2262_v13, %v1770_v34 }
 0xa4c   : > { %v1764_v37 = vsub.f32 1.5, %v1763_v35 }
 0xa4d   : > { %v1782_v38 = vadd.f32 %v2263_v33, %v1776_v36 }
 0xa4e   : > { %v1765_v39 = vmul.f32 %v2301_v26, %v1764_v37 }
 0xa4f   : > { %1788 = vst.msk [vmem:[#allocation2] sm:$0xff] %vm747_vm2, %v1782_v38 }
 0xa50   : > { %v1769_v43 = vsel %vm1768_vm0, %v2301_v26, %v1765_v39 }
 0xa51   : > { %v1771_v44 = vmul.f32 %v1769_v43, %v1737_v12 }
 0xa53   : > { %v1777_v14 = vmul.f32 %v2262_v13, %v1771_v44  ;;  %1795 = sbr.rel (%p2172_p6) target bundleno = 2652 (0xa5c), region = 76 }
 0xa55   : > { %v1783_v50 = vadd.f32 %v2263_v33, %v1777_v14 }
 0xa57   : > { %1789 = vst.msk [vmem:[#allocation2 + $0x8] sm:$0xff] %vm747_vm2, %v1783_v50 }
 0xa58   : > { %1796 = vst.msk [vmem:[#allocation4] sm:$0xff] %vm747_vm2, %v1782_v38  ;;  %v1798_v51 = vmul.f32 0.125, %v2727_v40  ;;  %v1799_v17 = vmul.f32 0.125, %v2733_v47 }
 0xa59   : > { %1797 = vst.msk [vmem:[#allocation4 + $0x8] sm:$0xff] %vm747_vm2, %v1783_v50 }
 0xa5a   : > { %1800 = vst.msk [vmem:[#allocation6] sm:$0xff] %vm830_vm3, %v1798_v51 }
 0xa5b   : > { %1801 = vst.msk [vmem:[#allocation6 + $0x8] sm:$0xff] %vm830_vm3, %v1799_v17 }
 0xa5c PF: > { %s2834_s30 = sadd.s32 4294967295, %s2389_s27   ;;  %s2836_s28 = sld [smem:[#allocation17_spill]] }
 0xa5d   : > { %p2774_p7 = scmp.eq.s32.totalorder %s2834_s30, 1  ;;  %s2393_s12 = smov [#allocation4]  }
 0xa5e   : > { %s1810_s13 = sshll.u32 %s2393_s12, 4  ;;  %s2394_s2 = smov 128   ;;  %s1811_s13 = int_to_ptr.vmem [resolvable:$true] %s1810_s13 }
 0xa5f   : > { %s2395_s15 = smov 8   ;;  %s2396_s17 = smov [#allocation6]  }
 0xa60   : > { %s1827_s3 = sshll.u32 %s2396_s17, 4  ;;  %s2837_s6 = sld [smem:[#allocation18_spill]]  ;;  %s1828_s3 = int_to_ptr.vmem [resolvable:$true] %s1827_s3 }
 0xa62   : > { %s1812_s29 = sshll.u32 %s2836_s28, 4  ;;  %s1813_s29 = int_to_ptr.hbm [resolvable:$true] %s1812_s29 }
 0xa63   : > { %2208 = dma.vmem_to_hbm [thread:$0]  (%p2774_p7), %s1811_s13, 256, %s1813_s29, [#allocation5], %s2394_s2, %s2394_s2, %s2395_s15  }
 0xa66   : > { %s1829_s20 = sshll.u32 %s2837_s6, 4  ;;  %s1830_s20 = int_to_ptr.hbm [resolvable:$true] %s1829_s20 }
 0xa67   : > { %2210 = dma.vmem_to_hbm [thread:$0]  (%p2774_p7), %s1828_s3, 256, %s1830_s20, [#allocation7], %s2394_s2, %s2394_s2, %s2395_s15  }
 0xa68   : > { %2372 = dma.done.wait (%p2774_p7), [#allocation5], 256  }
 0xa69   : > { %2374 = vsyncadd (%p2774_p7), [#allocation5], 4294967040 }
 0xa6a   : > { %2376 = dma.done.wait (%p2774_p7), [#allocation7], 256  }
 0xa6b   : > { %2378 = vsyncadd (%p2774_p7), [#allocation7], 4294967040 }
 0xa6c PF: > { %s26_s27 = sadd.s32 1, %s2389_s27   ;;  %s2838_s25 = sld [smem:[#allocation10_spill]] }
 0xa6d   : > { %p23_p8 = scmp.ge.s32.totalorder %s26_s27, 4   ;;  %s2839_s26 = sld [smem:[#allocation11_spill]] }
 0xa6f   :  { %25 = sbr.rel (!%p23_p8) target bundleno = 11 (0xb), region = 146 }
 0xa74   :  { %1851 = vsyncpa [#allocation5], 1 }
 0xa75   :  { %1853 = vsyncpa [#allocation5 + $0x1], 1 }
 0xa76   :  { %1854 = vsyncpa [#allocation7], 1 }

</bundles_post_ra>
